<compile_context>
chip_gen: v7x
topology: tpu7x:2x2x1
jax: 0.10.0
libtpu: 0.0.40
codegen_flags: <defaults>
</compile_context>

<pallas_src>
import functools
import math

import jax
import jax.numpy as jnp
import numpy as np
from jax import lax
from jax.experimental import pallas as pl
from jax.experimental.pallas import tpu as pltpu


# -----------------------------------------------------------------------------
# Fused Pallas kernel: 3 stacked bias-free LSTM layers over the whole sequence.
# -----------------------------------------------------------------------------
def _fused_lstm3_kernel(x_ref,
                        w1i_ref, w1h_ref,
                        w2i_ref, w2h_ref,
                        w3i_ref, w3h_ref,
                        out_ref, hn_ref, cn_ref,
                        act_sc,
                        *, seq_len, batch, hidden_sizes):
    T, B = seq_len, batch
    H1, H2, H3 = hidden_sizes

    def run_layer(x_all, wih_ref, whh_ref, H, write_h):
        """One bias-free LSTM layer over the whole sequence.

        x_all:   (T*B, Din) f32 value (already loaded from VMEM)
        wih_ref: (Din, 4H) ref, gate order [i, f, o, g]
        whh_ref: (H, 4H) ref,   gate order [i, f, o, g]
        write_h: callback(t, h) storing the step-t hidden state
        """
        # Hoisted input projection: no sequential dependence -> one big matmul
        # across all T*B rows instead of T tiny ones on the critical path.
        gx = jnp.dot(x_all, wih_ref[...],
                     preferred_element_type=jnp.float32)          # (T*B, 4H)
        whh = whh_ref[...]                                         # (H, 4H)

        h = jnp.zeros((B, H), jnp.float32)
        c = jnp.zeros((B, H), jnp.float32)
        for t in range(T):  # static full unroll: whole dep chain visible
            gates = gx[t * B:(t + 1) * B, :] + jnp.dot(
                h, whh, preferred_element_type=jnp.float32)        # (B, 4H)
            sig = jax.nn.sigmoid(gates[:, :3 * H])                 # [i, f, o]
            g = jnp.tanh(gates[:, 3 * H:])
            i = sig[:, 0 * H:1 * H]
            f = sig[:, 1 * H:2 * H]
            o = sig[:, 2 * H:3 * H]
            c = f * c + i * g
            h = o * jnp.tanh(c)
            write_h(t, h)
        return h, c

    def write_act(H):
        def w(t, h):
            act_sc[t * B:(t + 1) * B, 0:H] = h
        return w

    def write_out(t, h):
        out_ref[t * B:(t + 1) * B, :] = h.astype(out_ref.dtype)

    # Layer 1: input sequence -> activation scratch (VMEM).
    run_layer(x_ref[...].astype(jnp.float32), w1i_ref, w1h_ref, H1,
              write_act(H1))
    # Layer 2: scratch -> scratch, in place. Safe because the entire layer-1
    # output is loaded and projected (gx) before any layer-2 store happens.
    run_layer(act_sc[:, 0:H1], w2i_ref, w2h_ref, H2, write_act(H2))
    # Layer 3: scratch -> output; its final (h, c) is the returned state.
    h3, c3 = run_layer(act_sc[:, 0:H2], w3i_ref, w3h_ref, H3, write_out)

    hn_ref[...] = h3.astype(hn_ref.dtype)
    cn_ref[...] = c3.astype(cn_ref.dtype)


def _prep_weight(w):
    """PyTorch (4H, Din) weight -> (Din, 4H), gate order [i,f,g,o]->[i,f,o,g]."""
    H = w.shape[0] // 4
    w = jnp.concatenate([w[0 * H:1 * H], w[1 * H:2 * H],
                         w[3 * H:4 * H], w[2 * H:3 * H]], axis=0)
    return jnp.transpose(w)


# -----------------------------------------------------------------------------
# RecurrentModel forward: three stacked LSTM layers, one fused pallas_call.
# -----------------------------------------------------------------------------
@jax.jit
def recurrent_model_forward(x, params):
    (w1i, w1h), (w2i, w2h), (w3i, w3h) = params
    T, B, D = x.shape
    H1, H2, H3 = w1h.shape[1], w2h.shape[1], w3h.shape[1]
    Hmax = max(H1, H2)

    x2d = x.reshape(T * B, D)  # host-side reshape; kernel works on 2-D tiles
    args = (x2d,
            _prep_weight(w1i), _prep_weight(w1h),
            _prep_weight(w2i), _prep_weight(w2h),
            _prep_weight(w3i), _prep_weight(w3h))

    def full_spec(a):
        return pl.BlockSpec(a.shape, lambda i: (0,) * a.ndim)

    out2d, hn, cn = pl.pallas_call(
        functools.partial(_fused_lstm3_kernel, seq_len=T, batch=B,
                          hidden_sizes=(H1, H2, H3)),
        out_shape=(
            jax.ShapeDtypeStruct((T * B, H3), x.dtype),
            jax.ShapeDtypeStruct((B, H3), x.dtype),
            jax.ShapeDtypeStruct((B, H3), x.dtype),
        ),
        grid_spec=pltpu.PrefetchScalarGridSpec(
            num_scalar_prefetch=0,
            grid=(1,),
            in_specs=[full_spec(a) for a in args],
            out_specs=[
                pl.BlockSpec((T * B, H3), lambda i: (0, 0)),
                pl.BlockSpec((B, H3), lambda i: (0, 0)),
                pl.BlockSpec((B, H3), lambda i: (0, 0)),
            ],
            scratch_shapes=[pltpu.VMEM((T * B, Hmax), jnp.float32)],
        ),
        compiler_params=pltpu.CompilerParams(
            dimension_semantics=("arbitrary",)),
    )(*args)

    out = out2d.reshape(T, B, H3)
    # PyTorch state shape: (num_layers, B, H) with num_layers = 1
    return out, (hn[None, :, :], cn[None, :, :])


def init_params(key, input_size, hidden_sizes):
    """Deterministic init matching PyTorch LSTM shapes (uniform +/- 1/sqrt(H))."""
    params = []
    in_dim = input_size
    for h in hidden_sizes:
        key, k1, k2 = jax.random.split(key, 3)
        bound = 1.0 / math.sqrt(h)
        w_ih = jax.random.uniform(k1, (4 * h, in_dim), jnp.float32, -bound, bound)
        w_hh = jax.random.uniform(k2, (4 * h, h), jnp.float32, -bound, bound)
        params.append((w_ih, w_hh))
        in_dim = h
    return params


# -----------------------------------------------------------------------------
# Pure-JAX reference (lax.scan, PyTorch gate order) for correctness check.
# -----------------------------------------------------------------------------
def _ref_lstm_layer(x, w_ih, w_hh):
    H = w_ih.shape[0] // 4
    B = x.shape[1]

    def step(carry, x_t):
        h, c = carry
        gates = x_t @ w_ih.T + h @ w_hh.T
        i = jax.nn.sigmoid(gates[:, 0 * H:1 * H])
        f = jax.nn.sigmoid(gates[:, 1 * H:2 * H])
        g = jnp.tanh(gates[:, 2 * H:3 * H])
        o = jax.nn.sigmoid(gates[:, 3 * H:4 * H])
        c = f * c + i * g
        h = o * jnp.tanh(c)
        return (h, c), h

    init = (jnp.zeros((B, H), x.dtype), jnp.zeros((B, H), x.dtype))
    (hn, cn), out = lax.scan(step, init, x)
    return out, hn, cn


def _ref_forward(x, params):
    out = x
    hn = cn = None
    for (w_ih, w_hh) in params:
        out, hn, cn = _ref_lstm_layer(out, w_ih, w_hh)
    return out, (hn[None], cn[None])


# -----------------------------------------------------------------------------
if __name__ == "__main__":
    # RecurrentModel(noutputs=..., numLayers=1, inputSize=32,
    #                nHidden=[32, 32, 32], batchSize=2, ship2gpu=False)
    T, B, D = 8, 2, 32
    hidden_sizes = [32, 32, 32]

    key = jax.random.PRNGKey(0)
    key, kx = jax.random.split(key)
    x = jax.random.normal(kx, (T, B, D), dtype=jnp.float32)
    params = init_params(key, D, hidden_sizes)

    out, (h_n, c_n) = recurrent_model_forward(x, params)
    jax.block_until_ready((out, h_n, c_n))

    # sanity check vs. pure-JAX scan reference (f32 throughout)
    ref_out, (ref_h, ref_c) = _ref_forward(x, params)
    np.testing.assert_allclose(np.asarray(out), np.asarray(ref_out),
                               rtol=1e-5, atol=1e-5)
    np.testing.assert_allclose(np.asarray(h_n), np.asarray(ref_h),
                               rtol=1e-5, atol=1e-5)
    np.testing.assert_allclose(np.asarray(c_n), np.asarray(ref_c),
                               rtol=1e-5, atol=1e-5)

    assert out.shape == (T, B, hidden_sizes[-1])
    assert h_n.shape == (1, B, hidden_sizes[-1])
    assert c_n.shape == (1, B, hidden_sizes[-1])

    print("KERNEL_OK")
</pallas_src>

<mosaic_0001>
module attributes {stable_mosaic.version = 11 : i64} {
  func.func @_fused_lstm3_kernel(%arg0: i32, %arg1: memref<16x32xf32, #tpu.memory_space<vmem>>, %arg2: memref<32x128xf32, #tpu.memory_space<vmem>>, %arg3: memref<32x128xf32, #tpu.memory_space<vmem>>, %arg4: memref<32x128xf32, #tpu.memory_space<vmem>>, %arg5: memref<32x128xf32, #tpu.memory_space<vmem>>, %arg6: memref<32x128xf32, #tpu.memory_space<vmem>>, %arg7: memref<32x128xf32, #tpu.memory_space<vmem>>, %arg8: memref<16x32xf32, #tpu.memory_space<vmem>>, %arg9: memref<2x32xf32, #tpu.memory_space<vmem>>, %arg10: memref<2x32xf32, #tpu.memory_space<vmem>>, %arg11: memref<16x32xf32, #tpu.memory_space<vmem>>) attributes {dimension_semantics = [#tpu.dimension_semantics<arbitrary>], iteration_bounds = array<i64: 1>, scalar_prefetch = 0 : i64, scratch_operands = 1 : i64, tpu.core_type = #tpu.core_type<tc>, window_params = [{pipeline_mode = #tpu.pipeline_mode<synchronous>, transform_indices = @transform_0, window_bounds = array<i64: 16, 32>}, {pipeline_mode = #tpu.pipeline_mode<synchronous>, transform_indices = @transform_1, window_bounds = array<i64: 32, 128>}, {pipeline_mode = #tpu.pipeline_mode<synchronous>, transform_indices = @transform_2, window_bounds = array<i64: 32, 128>}, {pipeline_mode = #tpu.pipeline_mode<synchronous>, transform_indices = @transform_3, window_bounds = array<i64: 32, 128>}, {pipeline_mode = #tpu.pipeline_mode<synchronous>, transform_indices = @transform_4, window_bounds = array<i64: 32, 128>}, {pipeline_mode = #tpu.pipeline_mode<synchronous>, transform_indices = @transform_5, window_bounds = array<i64: 32, 128>}, {pipeline_mode = #tpu.pipeline_mode<synchronous>, transform_indices = @transform_6, window_bounds = array<i64: 32, 128>}, {pipeline_mode = #tpu.pipeline_mode<synchronous>, transform_indices = @transform_7, window_bounds = array<i64: 16, 32>}, {pipeline_mode = #tpu.pipeline_mode<synchronous>, transform_indices = @transform_8, window_bounds = array<i64: 2, 32>}, {pipeline_mode = #tpu.pipeline_mode<synchronous>, transform_indices = @transform_9, window_bounds = array<i64: 2, 32>}]} {
    %c0 = arith.constant 0 : index
    %c0_0 = arith.constant 0 : index
    %0 = vector.load %arg1[%c0, %c0_0] : memref<16x32xf32, #tpu.memory_space<vmem>>, vector<16x32xf32>
    %c0_1 = arith.constant 0 : index
    %c0_2 = arith.constant 0 : index
    %1 = vector.load %arg2[%c0_1, %c0_2] : memref<32x128xf32, #tpu.memory_space<vmem>>, vector<32x128xf32>
    %cst = arith.constant dense<0.000000e+00> : vector<16x128xf32>
    %2 = tpu.matmul %0, %1, %cst {dimension_numbers = #tpu.dot_dimension_numbers<[1], [0], [0], [1], [0, 0, 1, 1], [], []>} : vector<16x32xf32>, vector<32x128xf32>, vector<16x128xf32> -> vector<16x128xf32>
    %c0_3 = arith.constant 0 : index
    %c0_4 = arith.constant 0 : index
    %3 = vector.load %arg3[%c0_3, %c0_4] : memref<32x128xf32, #tpu.memory_space<vmem>>, vector<32x128xf32>
    %cst_5 = arith.constant 0.000000e+00 : f32
    %4 = vector.broadcast %cst_5 : f32 to vector<2x32xf32>
    %cst_6 = arith.constant 0.000000e+00 : f32
    %5 = vector.broadcast %cst_6 : f32 to vector<2x32xf32>
    %6 = vector.extract_strided_slice %2 {offsets = [0, 0], sizes = [2, 128], strides = [1, 1]} : vector<16x128xf32> to vector<2x128xf32>
    %cst_7 = arith.constant dense<0.000000e+00> : vector<2x128xf32>
    %7 = tpu.matmul %4, %3, %cst_7 {dimension_numbers = #tpu.dot_dimension_numbers<[1], [0], [0], [1], [0, 0, 1, 1], [], []>} : vector<2x32xf32>, vector<32x128xf32>, vector<2x128xf32> -> vector<2x128xf32>
    %8 = arith.addf %6, %7 : vector<2x128xf32>
    %9 = vector.extract_strided_slice %8 {offsets = [0, 0], sizes = [2, 96], strides = [1, 1]} : vector<2x128xf32> to vector<2x96xf32>
    %10 = arith.negf %9 : vector<2x96xf32>
    %11 = math.exp %10 : vector<2x96xf32>
    %cst_8 = arith.constant 1.000000e+00 : f32
    %12 = vector.broadcast %cst_8 : f32 to vector<2x96xf32>
    %13 = arith.addf %12, %11 : vector<2x96xf32>
    %14 = arith.divf %12, %13 : vector<2x96xf32>
    %15 = vector.extract_strided_slice %8 {offsets = [0, 96], sizes = [2, 32], strides = [1, 1]} : vector<2x128xf32> to vector<2x32xf32>
    %16 = math.tanh %15 : vector<2x32xf32>
    %17 = vector.extract_strided_slice %14 {offsets = [0, 0], sizes = [2, 32], strides = [1, 1]} : vector<2x96xf32> to vector<2x32xf32>
    %18 = vector.extract_strided_slice %14 {offsets = [0, 32], sizes = [2, 32], strides = [1, 1]} : vector<2x96xf32> to vector<2x32xf32>
    %19 = vector.extract_strided_slice %14 {offsets = [0, 64], sizes = [2, 32], strides = [1, 1]} : vector<2x96xf32> to vector<2x32xf32>
    %20 = arith.mulf %18, %5 : vector<2x32xf32>
    %21 = arith.mulf %17, %16 : vector<2x32xf32>
    %22 = arith.addf %20, %21 : vector<2x32xf32>
    %23 = math.tanh %22 : vector<2x32xf32>
    %24 = arith.mulf %19, %23 : vector<2x32xf32>
    %c0_9 = arith.constant 0 : index
    %c0_10 = arith.constant 0 : index
    %25 = vector.load %arg11[%c0_9, %c0_10] : memref<16x32xf32, #tpu.memory_space<vmem>>, vector<2x32xf32>
    tpu.vector_store %arg11[%c0_9, %c0_10], %24 {strides = array<i32>} : memref<16x32xf32, #tpu.memory_space<vmem>>, vector<2x32xf32>,
    %26 = vector.extract_strided_slice %2 {offsets = [2, 0], sizes = [2, 128], strides = [1, 1]} : vector<16x128xf32> to vector<2x128xf32>
    %cst_11 = arith.constant dense<0.000000e+00> : vector<2x128xf32>
    %27 = tpu.matmul %24, %3, %cst_11 {dimension_numbers = #tpu.dot_dimension_numbers<[1], [0], [0], [1], [0, 0, 1, 1], [], []>} : vector<2x32xf32>, vector<32x128xf32>, vector<2x128xf32> -> vector<2x128xf32>
    %28 = arith.addf %26, %27 : vector<2x128xf32>
    %29 = vector.extract_strided_slice %28 {offsets = [0, 0], sizes = [2, 96], strides = [1, 1]} : vector<2x128xf32> to vector<2x96xf32>
    %30 = arith.negf %29 : vector<2x96xf32>
    %31 = math.exp %30 : vector<2x96xf32>
    %cst_12 = arith.constant 1.000000e+00 : f32
    %32 = vector.broadcast %cst_12 : f32 to vector<2x96xf32>
    %33 = arith.addf %32, %31 : vector<2x96xf32>
    %34 = arith.divf %32, %33 : vector<2x96xf32>
    %35 = vector.extract_strided_slice %28 {offsets = [0, 96], sizes = [2, 32], strides = [1, 1]} : vector<2x128xf32> to vector<2x32xf32>
    %36 = math.tanh %35 : vector<2x32xf32>
    %37 = vector.extract_strided_slice %34 {offsets = [0, 0], sizes = [2, 32], strides = [1, 1]} : vector<2x96xf32> to vector<2x32xf32>
    %38 = vector.extract_strided_slice %34 {offsets = [0, 32], sizes = [2, 32], strides = [1, 1]} : vector<2x96xf32> to vector<2x32xf32>
    %39 = vector.extract_strided_slice %34 {offsets = [0, 64], sizes = [2, 32], strides = [1, 1]} : vector<2x96xf32> to vector<2x32xf32>
    %40 = arith.mulf %38, %22 : vector<2x32xf32>
    %41 = arith.mulf %37, %36 : vector<2x32xf32>
    %42 = arith.addf %40, %41 : vector<2x32xf32>
    %43 = math.tanh %42 : vector<2x32xf32>
    %44 = arith.mulf %39, %43 : vector<2x32xf32>
    %c2 = arith.constant 2 : index
    %c0_13 = arith.constant 0 : index
    %45 = vector.load %arg11[%c2, %c0_13] : memref<16x32xf32, #tpu.memory_space<vmem>>, vector<2x32xf32>
    tpu.vector_store %arg11[%c2, %c0_13], %44 {strides = array<i32>} : memref<16x32xf32, #tpu.memory_space<vmem>>, vector<2x32xf32>,
    %46 = vector.extract_strided_slice %2 {offsets = [4, 0], sizes = [2, 128], strides = [1, 1]} : vector<16x128xf32> to vector<2x128xf32>
    %cst_14 = arith.constant dense<0.000000e+00> : vector<2x128xf32>
    %47 = tpu.matmul %44, %3, %cst_14 {dimension_numbers = #tpu.dot_dimension_numbers<[1], [0], [0], [1], [0, 0, 1, 1], [], []>} : vector<2x32xf32>, vector<32x128xf32>, vector<2x128xf32> -> vector<2x128xf32>
    %48 = arith.addf %46, %47 : vector<2x128xf32>
    %49 = vector.extract_strided_slice %48 {offsets = [0, 0], sizes = [2, 96], strides = [1, 1]} : vector<2x128xf32> to vector<2x96xf32>
    %50 = arith.negf %49 : vector<2x96xf32>
    %51 = math.exp %50 : vector<2x96xf32>
    %cst_15 = arith.constant 1.000000e+00 : f32
    %52 = vector.broadcast %cst_15 : f32 to vector<2x96xf32>
    %53 = arith.addf %52, %51 : vector<2x96xf32>
    %54 = arith.divf %52, %53 : vector<2x96xf32>
    %55 = vector.extract_strided_slice %48 {offsets = [0, 96], sizes = [2, 32], strides = [1, 1]} : vector<2x128xf32> to vector<2x32xf32>
    %56 = math.tanh %55 : vector<2x32xf32>
    %57 = vector.extract_strided_slice %54 {offsets = [0, 0], sizes = [2, 32], strides = [1, 1]} : vector<2x96xf32> to vector<2x32xf32>
    %58 = vector.extract_strided_slice %54 {offsets = [0, 32], sizes = [2, 32], strides = [1, 1]} : vector<2x96xf32> to vector<2x32xf32>
    %59 = vector.extract_strided_slice %54 {offsets = [0, 64], sizes = [2, 32], strides = [1, 1]} : vector<2x96xf32> to vector<2x32xf32>
    %60 = arith.mulf %58, %42 : vector<2x32xf32>
    %61 = arith.mulf %57, %56 : vector<2x32xf32>
    %62 = arith.addf %60, %61 : vector<2x32xf32>
    %63 = math.tanh %62 : vector<2x32xf32>
    %64 = arith.mulf %59, %63 : vector<2x32xf32>
    %c4 = arith.constant 4 : index
    %c0_16 = arith.constant 0 : index
    %65 = vector.load %arg11[%c4, %c0_16] : memref<16x32xf32, #tpu.memory_space<vmem>>, vector<2x32xf32>
    tpu.vector_store %arg11[%c4, %c0_16], %64 {strides = array<i32>} : memref<16x32xf32, #tpu.memory_space<vmem>>, vector<2x32xf32>,
    %66 = vector.extract_strided_slice %2 {offsets = [6, 0], sizes = [2, 128], strides = [1, 1]} : vector<16x128xf32> to vector<2x128xf32>
    %cst_17 = arith.constant dense<0.000000e+00> : vector<2x128xf32>
    %67 = tpu.matmul %64, %3, %cst_17 {dimension_numbers = #tpu.dot_dimension_numbers<[1], [0], [0], [1], [0, 0, 1, 1], [], []>} : vector<2x32xf32>, vector<32x128xf32>, vector<2x128xf32> -> vector<2x128xf32>
    %68 = arith.addf %66, %67 : vector<2x128xf32>
    %69 = vector.extract_strided_slice %68 {offsets = [0, 0], sizes = [2, 96], strides = [1, 1]} : vector<2x128xf32> to vector<2x96xf32>
    %70 = arith.negf %69 : vector<2x96xf32>
    %71 = math.exp %70 : vector<2x96xf32>
    %cst_18 = arith.constant 1.000000e+00 : f32
    %72 = vector.broadcast %cst_18 : f32 to vector<2x96xf32>
    %73 = arith.addf %72, %71 : vector<2x96xf32>
    %74 = arith.divf %72, %73 : vector<2x96xf32>
    %75 = vector.extract_strided_slice %68 {offsets = [0, 96], sizes = [2, 32], strides = [1, 1]} : vector<2x128xf32> to vector<2x32xf32>
    %76 = math.tanh %75 : vector<2x32xf32>
    %77 = vector.extract_strided_slice %74 {offsets = [0, 0], sizes = [2, 32], strides = [1, 1]} : vector<2x96xf32> to vector<2x32xf32>
    %78 = vector.extract_strided_slice %74 {offsets = [0, 32], sizes = [2, 32], strides = [1, 1]} : vector<2x96xf32> to vector<2x32xf32>
    %79 = vector.extract_strided_slice %74 {offsets = [0, 64], sizes = [2, 32], strides = [1, 1]} : vector<2x96xf32> to vector<2x32xf32>
    %80 = arith.mulf %78, %62 : vector<2x32xf32>
    %81 = arith.mulf %77, %76 : vector<2x32xf32>
    %82 = arith.addf %80, %81 : vector<2x32xf32>
    %83 = math.tanh %82 : vector<2x32xf32>
    %84 = arith.mulf %79, %83 : vector<2x32xf32>
    %c6 = arith.constant 6 : index
    %c0_19 = arith.constant 0 : index
    %85 = vector.load %arg11[%c6, %c0_19] : memref<16x32xf32, #tpu.memory_space<vmem>>, vector<2x32xf32>
    tpu.vector_store %arg11[%c6, %c0_19], %84 {strides = array<i32>} : memref<16x32xf32, #tpu.memory_space<vmem>>, vector<2x32xf32>,
    %86 = vector.extract_strided_slice %2 {offsets = [8, 0], sizes = [2, 128], strides = [1, 1]} : vector<16x128xf32> to vector<2x128xf32>
    %cst_20 = arith.constant dense<0.000000e+00> : vector<2x128xf32>
    %87 = tpu.matmul %84, %3, %cst_20 {dimension_numbers = #tpu.dot_dimension_numbers<[1], [0], [0], [1], [0, 0, 1, 1], [], []>} : vector<2x32xf32>, vector<32x128xf32>, vector<2x128xf32> -> vector<2x128xf32>
    %88 = arith.addf %86, %87 : vector<2x128xf32>
    %89 = vector.extract_strided_slice %88 {offsets = [0, 0], sizes = [2, 96], strides = [1, 1]} : vector<2x128xf32> to vector<2x96xf32>
    %90 = arith.negf %89 : vector<2x96xf32>
    %91 = math.exp %90 : vector<2x96xf32>
    %cst_21 = arith.constant 1.000000e+00 : f32
    %92 = vector.broadcast %cst_21 : f32 to vector<2x96xf32>
    %93 = arith.addf %92, %91 : vector<2x96xf32>
    %94 = arith.divf %92, %93 : vector<2x96xf32>
    %95 = vector.extract_strided_slice %88 {offsets = [0, 96], sizes = [2, 32], strides = [1, 1]} : vector<2x128xf32> to vector<2x32xf32>
    %96 = math.tanh %95 : vector<2x32xf32>
    %97 = vector.extract_strided_slice %94 {offsets = [0, 0], sizes = [2, 32], strides = [1, 1]} : vector<2x96xf32> to vector<2x32xf32>
    %98 = vector.extract_strided_slice %94 {offsets = [0, 32], sizes = [2, 32], strides = [1, 1]} : vector<2x96xf32> to vector<2x32xf32>
    %99 = vector.extract_strided_slice %94 {offsets = [0, 64], sizes = [2, 32], strides = [1, 1]} : vector<2x96xf32> to vector<2x32xf32>
    %100 = arith.mulf %98, %82 : vector<2x32xf32>
    %101 = arith.mulf %97, %96 : vector<2x32xf32>
    %102 = arith.addf %100, %101 : vector<2x32xf32>
    %103 = math.tanh %102 : vector<2x32xf32>
    %104 = arith.mulf %99, %103 : vector<2x32xf32>
    %c8 = arith.constant 8 : index
    %c0_22 = arith.constant 0 : index
    %105 = vector.load %arg11[%c8, %c0_22] : memref<16x32xf32, #tpu.memory_space<vmem>>, vector<2x32xf32>
    tpu.vector_store %arg11[%c8, %c0_22], %104 {strides = array<i32>} : memref<16x32xf32, #tpu.memory_space<vmem>>, vector<2x32xf32>,
    %106 = vector.extract_strided_slice %2 {offsets = [10, 0], sizes = [2, 128], strides = [1, 1]} : vector<16x128xf32> to vector<2x128xf32>
    %cst_23 = arith.constant dense<0.000000e+00> : vector<2x128xf32>
    %107 = tpu.matmul %104, %3, %cst_23 {dimension_numbers = #tpu.dot_dimension_numbers<[1], [0], [0], [1], [0, 0, 1, 1], [], []>} : vector<2x32xf32>, vector<32x128xf32>, vector<2x128xf32> -> vector<2x128xf32>
    %108 = arith.addf %106, %107 : vector<2x128xf32>
    %109 = vector.extract_strided_slice %108 {offsets = [0, 0], sizes = [2, 96], strides = [1, 1]} : vector<2x128xf32> to vector<2x96xf32>
    %110 = arith.negf %109 : vector<2x96xf32>
    %111 = math.exp %110 : vector<2x96xf32>
    %cst_24 = arith.constant 1.000000e+00 : f32
    %112 = vector.broadcast %cst_24 : f32 to vector<2x96xf32>
    %113 = arith.addf %112, %111 : vector<2x96xf32>
    %114 = arith.divf %112, %113 : vector<2x96xf32>
    %115 = vector.extract_strided_slice %108 {offsets = [0, 96], sizes = [2, 32], strides = [1, 1]} : vector<2x128xf32> to vector<2x32xf32>
    %116 = math.tanh %115 : vector<2x32xf32>
    %117 = vector.extract_strided_slice %114 {offsets = [0, 0], sizes = [2, 32], strides = [1, 1]} : vector<2x96xf32> to vector<2x32xf32>
    %118 = vector.extract_strided_slice %114 {offsets = [0, 32], sizes = [2, 32], strides = [1, 1]} : vector<2x96xf32> to vector<2x32xf32>
    %119 = vector.extract_strided_slice %114 {offsets = [0, 64], sizes = [2, 32], strides = [1, 1]} : vector<2x96xf32> to vector<2x32xf32>
    %120 = arith.mulf %118, %102 : vector<2x32xf32>
    %121 = arith.mulf %117, %116 : vector<2x32xf32>
    %122 = arith.addf %120, %121 : vector<2x32xf32>
    %123 = math.tanh %122 : vector<2x32xf32>
    %124 = arith.mulf %119, %123 : vector<2x32xf32>
    %c10 = arith.constant 10 : index
    %c0_25 = arith.constant 0 : index
    %125 = vector.load %arg11[%c10, %c0_25] : memref<16x32xf32, #tpu.memory_space<vmem>>, vector<2x32xf32>
    tpu.vector_store %arg11[%c10, %c0_25], %124 {strides = array<i32>} : memref<16x32xf32, #tpu.memory_space<vmem>>, vector<2x32xf32>,
    %126 = vector.extract_strided_slice %2 {offsets = [12, 0], sizes = [2, 128], strides = [1, 1]} : vector<16x128xf32> to vector<2x128xf32>
    %cst_26 = arith.constant dense<0.000000e+00> : vector<2x128xf32>
    %127 = tpu.matmul %124, %3, %cst_26 {dimension_numbers = #tpu.dot_dimension_numbers<[1], [0], [0], [1], [0, 0, 1, 1], [], []>} : vector<2x32xf32>, vector<32x128xf32>, vector<2x128xf32> -> vector<2x128xf32>
    %128 = arith.addf %126, %127 : vector<2x128xf32>
    %129 = vector.extract_strided_slice %128 {offsets = [0, 0], sizes = [2, 96], strides = [1, 1]} : vector<2x128xf32> to vector<2x96xf32>
    %130 = arith.negf %129 : vector<2x96xf32>
    %131 = math.exp %130 : vector<2x96xf32>
    %cst_27 = arith.constant 1.000000e+00 : f32
    %132 = vector.broadcast %cst_27 : f32 to vector<2x96xf32>
    %133 = arith.addf %132, %131 : vector<2x96xf32>
    %134 = arith.divf %132, %133 : vector<2x96xf32>
    %135 = vector.extract_strided_slice %128 {offsets = [0, 96], sizes = [2, 32], strides = [1, 1]} : vector<2x128xf32> to vector<2x32xf32>
    %136 = math.tanh %135 : vector<2x32xf32>
    %137 = vector.extract_strided_slice %134 {offsets = [0, 0], sizes = [2, 32], strides = [1, 1]} : vector<2x96xf32> to vector<2x32xf32>
    %138 = vector.extract_strided_slice %134 {offsets = [0, 32], sizes = [2, 32], strides = [1, 1]} : vector<2x96xf32> to vector<2x32xf32>
    %139 = vector.extract_strided_slice %134 {offsets = [0, 64], sizes = [2, 32], strides = [1, 1]} : vector<2x96xf32> to vector<2x32xf32>
    %140 = arith.mulf %138, %122 : vector<2x32xf32>
    %141 = arith.mulf %137, %136 : vector<2x32xf32>
    %142 = arith.addf %140, %141 : vector<2x32xf32>
    %143 = math.tanh %142 : vector<2x32xf32>
    %144 = arith.mulf %139, %143 : vector<2x32xf32>
    %c12 = arith.constant 12 : index
    %c0_28 = arith.constant 0 : index
    %145 = vector.load %arg11[%c12, %c0_28] : memref<16x32xf32, #tpu.memory_space<vmem>>, vector<2x32xf32>
    tpu.vector_store %arg11[%c12, %c0_28], %144 {strides = array<i32>} : memref<16x32xf32, #tpu.memory_space<vmem>>, vector<2x32xf32>,
    %146 = vector.extract_strided_slice %2 {offsets = [14, 0], sizes = [2, 128], strides = [1, 1]} : vector<16x128xf32> to vector<2x128xf32>
    %cst_29 = arith.constant dense<0.000000e+00> : vector<2x128xf32>
    %147 = tpu.matmul %144, %3, %cst_29 {dimension_numbers = #tpu.dot_dimension_numbers<[1], [0], [0], [1], [0, 0, 1, 1], [], []>} : vector<2x32xf32>, vector<32x128xf32>, vector<2x128xf32> -> vector<2x128xf32>
    %148 = arith.addf %146, %147 : vector<2x128xf32>
    %149 = vector.extract_strided_slice %148 {offsets = [0, 0], sizes = [2, 96], strides = [1, 1]} : vector<2x128xf32> to vector<2x96xf32>
    %150 = arith.negf %149 : vector<2x96xf32>
    %151 = math.exp %150 : vector<2x96xf32>
    %cst_30 = arith.constant 1.000000e+00 : f32
    %152 = vector.broadcast %cst_30 : f32 to vector<2x96xf32>
    %153 = arith.addf %152, %151 : vector<2x96xf32>
    %154 = arith.divf %152, %153 : vector<2x96xf32>
    %155 = vector.extract_strided_slice %148 {offsets = [0, 96], sizes = [2, 32], strides = [1, 1]} : vector<2x128xf32> to vector<2x32xf32>
    %156 = math.tanh %155 : vector<2x32xf32>
    %157 = vector.extract_strided_slice %154 {offsets = [0, 0], sizes = [2, 32], strides = [1, 1]} : vector<2x96xf32> to vector<2x32xf32>
    %158 = vector.extract_strided_slice %154 {offsets = [0, 32], sizes = [2, 32], strides = [1, 1]} : vector<2x96xf32> to vector<2x32xf32>
    %159 = vector.extract_strided_slice %154 {offsets = [0, 64], sizes = [2, 32], strides = [1, 1]} : vector<2x96xf32> to vector<2x32xf32>
    %160 = arith.mulf %158, %142 : vector<2x32xf32>
    %161 = arith.mulf %157, %156 : vector<2x32xf32>
    %162 = arith.addf %160, %161 : vector<2x32xf32>
    %163 = math.tanh %162 : vector<2x32xf32>
    %164 = arith.mulf %159, %163 : vector<2x32xf32>
    %c14 = arith.constant 14 : index
    %c0_31 = arith.constant 0 : index
    %165 = vector.load %arg11[%c14, %c0_31] : memref<16x32xf32, #tpu.memory_space<vmem>>, vector<2x32xf32>
    tpu.vector_store %arg11[%c14, %c0_31], %164 {strides = array<i32>} : memref<16x32xf32, #tpu.memory_space<vmem>>, vector<2x32xf32>,
    %c0_32 = arith.constant 0 : index
    %c0_33 = arith.constant 0 : index
    %166 = vector.load %arg11[%c0_32, %c0_33] : memref<16x32xf32, #tpu.memory_space<vmem>>, vector<16x32xf32>
    %c0_34 = arith.constant 0 : index
    %c0_35 = arith.constant 0 : index
    %167 = vector.load %arg4[%c0_34, %c0_35] : memref<32x128xf32, #tpu.memory_space<vmem>>, vector<32x128xf32>
    %cst_36 = arith.constant dense<0.000000e+00> : vector<16x128xf32>
    %168 = tpu.matmul %166, %167, %cst_36 {dimension_numbers = #tpu.dot_dimension_numbers<[1], [0], [0], [1], [0, 0, 1, 1], [], []>} : vector<16x32xf32>, vector<32x128xf32>, vector<16x128xf32> -> vector<16x128xf32>
    %c0_37 = arith.constant 0 : index
    %c0_38 = arith.constant 0 : index
    %169 = vector.load %arg5[%c0_37, %c0_38] : memref<32x128xf32, #tpu.memory_space<vmem>>, vector<32x128xf32>
    %cst_39 = arith.constant 0.000000e+00 : f32
    %170 = vector.broadcast %cst_39 : f32 to vector<2x32xf32>
    %cst_40 = arith.constant 0.000000e+00 : f32
    %171 = vector.broadcast %cst_40 : f32 to vector<2x32xf32>
    %172 = vector.extract_strided_slice %168 {offsets = [0, 0], sizes = [2, 128], strides = [1, 1]} : vector<16x128xf32> to vector<2x128xf32>
    %cst_41 = arith.constant dense<0.000000e+00> : vector<2x128xf32>
    %173 = tpu.matmul %170, %169, %cst_41 {dimension_numbers = #tpu.dot_dimension_numbers<[1], [0], [0], [1], [0, 0, 1, 1], [], []>} : vector<2x32xf32>, vector<32x128xf32>, vector<2x128xf32> -> vector<2x128xf32>
    %174 = arith.addf %172, %173 : vector<2x128xf32>
    %175 = vector.extract_strided_slice %174 {offsets = [0, 0], sizes = [2, 96], strides = [1, 1]} : vector<2x128xf32> to vector<2x96xf32>
    %176 = arith.negf %175 : vector<2x96xf32>
    %177 = math.exp %176 : vector<2x96xf32>
    %cst_42 = arith.constant 1.000000e+00 : f32
    %178 = vector.broadcast %cst_42 : f32 to vector<2x96xf32>
    %179 = arith.addf %178, %177 : vector<2x96xf32>
    %180 = arith.divf %178, %179 : vector<2x96xf32>
    %181 = vector.extract_strided_slice %174 {offsets = [0, 96], sizes = [2, 32], strides = [1, 1]} : vector<2x128xf32> to vector<2x32xf32>
    %182 = math.tanh %181 : vector<2x32xf32>
    %183 = vector.extract_strided_slice %180 {offsets = [0, 0], sizes = [2, 32], strides = [1, 1]} : vector<2x96xf32> to vector<2x32xf32>
    %184 = vector.extract_strided_slice %180 {offsets = [0, 32], sizes = [2, 32], strides = [1, 1]} : vector<2x96xf32> to vector<2x32xf32>
    %185 = vector.extract_strided_slice %180 {offsets = [0, 64], sizes = [2, 32], strides = [1, 1]} : vector<2x96xf32> to vector<2x32xf32>
    %186 = arith.mulf %184, %171 : vector<2x32xf32>
    %187 = arith.mulf %183, %182 : vector<2x32xf32>
    %188 = arith.addf %186, %187 : vector<2x32xf32>
    %189 = math.tanh %188 : vector<2x32xf32>
    %190 = arith.mulf %185, %189 : vector<2x32xf32>
    %c0_43 = arith.constant 0 : index
    %c0_44 = arith.constant 0 : index
    %191 = vector.load %arg11[%c0_43, %c0_44] : memref<16x32xf32, #tpu.memory_space<vmem>>, vector<2x32xf32>
    tpu.vector_store %arg11[%c0_43, %c0_44], %190 {strides = array<i32>} : memref<16x32xf32, #tpu.memory_space<vmem>>, vector<2x32xf32>,
    %192 = vector.extract_strided_slice %168 {offsets = [2, 0], sizes = [2, 128], strides = [1, 1]} : vector<16x128xf32> to vector<2x128xf32>
    %cst_45 = arith.constant dense<0.000000e+00> : vector<2x128xf32>
    %193 = tpu.matmul %190, %169, %cst_45 {dimension_numbers = #tpu.dot_dimension_numbers<[1], [0], [0], [1], [0, 0, 1, 1], [], []>} : vector<2x32xf32>, vector<32x128xf32>, vector<2x128xf32> -> vector<2x128xf32>
    %194 = arith.addf %192, %193 : vector<2x128xf32>
    %195 = vector.extract_strided_slice %194 {offsets = [0, 0], sizes = [2, 96], strides = [1, 1]} : vector<2x128xf32> to vector<2x96xf32>
    %196 = arith.negf %195 : vector<2x96xf32>
    %197 = math.exp %196 : vector<2x96xf32>
    %cst_46 = arith.constant 1.000000e+00 : f32
    %198 = vector.broadcast %cst_46 : f32 to vector<2x96xf32>
    %199 = arith.addf %198, %197 : vector<2x96xf32>
    %200 = arith.divf %198, %199 : vector<2x96xf32>
    %201 = vector.extract_strided_slice %194 {offsets = [0, 96], sizes = [2, 32], strides = [1, 1]} : vector<2x128xf32> to vector<2x32xf32>
    %202 = math.tanh %201 : vector<2x32xf32>
    %203 = vector.extract_strided_slice %200 {offsets = [0, 0], sizes = [2, 32], strides = [1, 1]} : vector<2x96xf32> to vector<2x32xf32>
    %204 = vector.extract_strided_slice %200 {offsets = [0, 32], sizes = [2, 32], strides = [1, 1]} : vector<2x96xf32> to vector<2x32xf32>
    %205 = vector.extract_strided_slice %200 {offsets = [0, 64], sizes = [2, 32], strides = [1, 1]} : vector<2x96xf32> to vector<2x32xf32>
    %206 = arith.mulf %204, %188 : vector<2x32xf32>
    %207 = arith.mulf %203, %202 : vector<2x32xf32>
    %208 = arith.addf %206, %207 : vector<2x32xf32>
    %209 = math.tanh %208 : vector<2x32xf32>
    %210 = arith.mulf %205, %209 : vector<2x32xf32>
    %c2_47 = arith.constant 2 : index
    %c0_48 = arith.constant 0 : index
    %211 = vector.load %arg11[%c2_47, %c0_48] : memref<16x32xf32, #tpu.memory_space<vmem>>, vector<2x32xf32>
    tpu.vector_store %arg11[%c2_47, %c0_48], %210 {strides = array<i32>} : memref<16x32xf32, #tpu.memory_space<vmem>>, vector<2x32xf32>,
    %212 = vector.extract_strided_slice %168 {offsets = [4, 0], sizes = [2, 128], strides = [1, 1]} : vector<16x128xf32> to vector<2x128xf32>
    %cst_49 = arith.constant dense<0.000000e+00> : vector<2x128xf32>
    %213 = tpu.matmul %210, %169, %cst_49 {dimension_numbers = #tpu.dot_dimension_numbers<[1], [0], [0], [1], [0, 0, 1, 1], [], []>} : vector<2x32xf32>, vector<32x128xf32>, vector<2x128xf32> -> vector<2x128xf32>
    %214 = arith.addf %212, %213 : vector<2x128xf32>
    %215 = vector.extract_strided_slice %214 {offsets = [0, 0], sizes = [2, 96], strides = [1, 1]} : vector<2x128xf32> to vector<2x96xf32>
    %216 = arith.negf %215 : vector<2x96xf32>
    %217 = math.exp %216 : vector<2x96xf32>
    %cst_50 = arith.constant 1.000000e+00 : f32
    %218 = vector.broadcast %cst_50 : f32 to vector<2x96xf32>
    %219 = arith.addf %218, %217 : vector<2x96xf32>
    %220 = arith.divf %218, %219 : vector<2x96xf32>
    %221 = vector.extract_strided_slice %214 {offsets = [0, 96], sizes = [2, 32], strides = [1, 1]} : vector<2x128xf32> to vector<2x32xf32>
    %222 = math.tanh %221 : vector<2x32xf32>
    %223 = vector.extract_strided_slice %220 {offsets = [0, 0], sizes = [2, 32], strides = [1, 1]} : vector<2x96xf32> to vector<2x32xf32>
    %224 = vector.extract_strided_slice %220 {offsets = [0, 32], sizes = [2, 32], strides = [1, 1]} : vector<2x96xf32> to vector<2x32xf32>
    %225 = vector.extract_strided_slice %220 {offsets = [0, 64], sizes = [2, 32], strides = [1, 1]} : vector<2x96xf32> to vector<2x32xf32>
    %226 = arith.mulf %224, %208 : vector<2x32xf32>
    %227 = arith.mulf %223, %222 : vector<2x32xf32>
    %228 = arith.addf %226, %227 : vector<2x32xf32>
    %229 = math.tanh %228 : vector<2x32xf32>
    %230 = arith.mulf %225, %229 : vector<2x32xf32>
    %c4_51 = arith.constant 4 : index
    %c0_52 = arith.constant 0 : index
    %231 = vector.load %arg11[%c4_51, %c0_52] : memref<16x32xf32, #tpu.memory_space<vmem>>, vector<2x32xf32>
    tpu.vector_store %arg11[%c4_51, %c0_52], %230 {strides = array<i32>} : memref<16x32xf32, #tpu.memory_space<vmem>>, vector<2x32xf32>,
    %232 = vector.extract_strided_slice %168 {offsets = [6, 0], sizes = [2, 128], strides = [1, 1]} : vector<16x128xf32> to vector<2x128xf32>
    %cst_53 = arith.constant dense<0.000000e+00> : vector<2x128xf32>
    %233 = tpu.matmul %230, %169, %cst_53 {dimension_numbers = #tpu.dot_dimension_numbers<[1], [0], [0], [1], [0, 0, 1, 1], [], []>} : vector<2x32xf32>, vector<32x128xf32>, vector<2x128xf32> -> vector<2x128xf32>
    %234 = arith.addf %232, %233 : vector<2x128xf32>
    %235 = vector.extract_strided_slice %234 {offsets = [0, 0], sizes = [2, 96], strides = [1, 1]} : vector<2x128xf32> to vector<2x96xf32>
    %236 = arith.negf %235 : vector<2x96xf32>
    %237 = math.exp %236 : vector<2x96xf32>
    %cst_54 = arith.constant 1.000000e+00 : f32
    %238 = vector.broadcast %cst_54 : f32 to vector<2x96xf32>
    %239 = arith.addf %238, %237 : vector<2x96xf32>
    %240 = arith.divf %238, %239 : vector<2x96xf32>
    %241 = vector.extract_strided_slice %234 {offsets = [0, 96], sizes = [2, 32], strides = [1, 1]} : vector<2x128xf32> to vector<2x32xf32>
    %242 = math.tanh %241 : vector<2x32xf32>
    %243 = vector.extract_strided_slice %240 {offsets = [0, 0], sizes = [2, 32], strides = [1, 1]} : vector<2x96xf32> to vector<2x32xf32>
    %244 = vector.extract_strided_slice %240 {offsets = [0, 32], sizes = [2, 32], strides = [1, 1]} : vector<2x96xf32> to vector<2x32xf32>
    %245 = vector.extract_strided_slice %240 {offsets = [0, 64], sizes = [2, 32], strides = [1, 1]} : vector<2x96xf32> to vector<2x32xf32>
    %246 = arith.mulf %244, %228 : vector<2x32xf32>
    %247 = arith.mulf %243, %242 : vector<2x32xf32>
    %248 = arith.addf %246, %247 : vector<2x32xf32>
    %249 = math.tanh %248 : vector<2x32xf32>
    %250 = arith.mulf %245, %249 : vector<2x32xf32>
    %c6_55 = arith.constant 6 : index
    %c0_56 = arith.constant 0 : index
    %251 = vector.load %arg11[%c6_55, %c0_56] : memref<16x32xf32, #tpu.memory_space<vmem>>, vector<2x32xf32>
    tpu.vector_store %arg11[%c6_55, %c0_56], %250 {strides = array<i32>} : memref<16x32xf32, #tpu.memory_space<vmem>>, vector<2x32xf32>,
    %252 = vector.extract_strided_slice %168 {offsets = [8, 0], sizes = [2, 128], strides = [1, 1]} : vector<16x128xf32> to vector<2x128xf32>
    %cst_57 = arith.constant dense<0.000000e+00> : vector<2x128xf32>
    %253 = tpu.matmul %250, %169, %cst_57 {dimension_numbers = #tpu.dot_dimension_numbers<[1], [0], [0], [1], [0, 0, 1, 1], [], []>} : vector<2x32xf32>, vector<32x128xf32>, vector<2x128xf32> -> vector<2x128xf32>
    %254 = arith.addf %252, %253 : vector<2x128xf32>
    %255 = vector.extract_strided_slice %254 {offsets = [0, 0], sizes = [2, 96], strides = [1, 1]} : vector<2x128xf32> to vector<2x96xf32>
    %256 = arith.negf %255 : vector<2x96xf32>
    %257 = math.exp %256 : vector<2x96xf32>
    %cst_58 = arith.constant 1.000000e+00 : f32
    %258 = vector.broadcast %cst_58 : f32 to vector<2x96xf32>
    %259 = arith.addf %258, %257 : vector<2x96xf32>
    %260 = arith.divf %258, %259 : vector<2x96xf32>
    %261 = vector.extract_strided_slice %254 {offsets = [0, 96], sizes = [2, 32], strides = [1, 1]} : vector<2x128xf32> to vector<2x32xf32>
    %262 = math.tanh %261 : vector<2x32xf32>
    %263 = vector.extract_strided_slice %260 {offsets = [0, 0], sizes = [2, 32], strides = [1, 1]} : vector<2x96xf32> to vector<2x32xf32>
    %264 = vector.extract_strided_slice %260 {offsets = [0, 32], sizes = [2, 32], strides = [1, 1]} : vector<2x96xf32> to vector<2x32xf32>
    %265 = vector.extract_strided_slice %260 {offsets = [0, 64], sizes = [2, 32], strides = [1, 1]} : vector<2x96xf32> to vector<2x32xf32>
    %266 = arith.mulf %264, %248 : vector<2x32xf32>
    %267 = arith.mulf %263, %262 : vector<2x32xf32>
    %268 = arith.addf %266, %267 : vector<2x32xf32>
    %269 = math.tanh %268 : vector<2x32xf32>
    %270 = arith.mulf %265, %269 : vector<2x32xf32>
    %c8_59 = arith.constant 8 : index
    %c0_60 = arith.constant 0 : index
    %271 = vector.load %arg11[%c8_59, %c0_60] : memref<16x32xf32, #tpu.memory_space<vmem>>, vector<2x32xf32>
    tpu.vector_store %arg11[%c8_59, %c0_60], %270 {strides = array<i32>} : memref<16x32xf32, #tpu.memory_space<vmem>>, vector<2x32xf32>,
    %272 = vector.extract_strided_slice %168 {offsets = [10, 0], sizes = [2, 128], strides = [1, 1]} : vector<16x128xf32> to vector<2x128xf32>
    %cst_61 = arith.constant dense<0.000000e+00> : vector<2x128xf32>
    %273 = tpu.matmul %270, %169, %cst_61 {dimension_numbers = #tpu.dot_dimension_numbers<[1], [0], [0], [1], [0, 0, 1, 1], [], []>} : vector<2x32xf32>, vector<32x128xf32>, vector<2x128xf32> -> vector<2x128xf32>
    %274 = arith.addf %272, %273 : vector<2x128xf32>
    %275 = vector.extract_strided_slice %274 {offsets = [0, 0], sizes = [2, 96], strides = [1, 1]} : vector<2x128xf32> to vector<2x96xf32>
    %276 = arith.negf %275 : vector<2x96xf32>
    %277 = math.exp %276 : vector<2x96xf32>
    %cst_62 = arith.constant 1.000000e+00 : f32
    %278 = vector.broadcast %cst_62 : f32 to vector<2x96xf32>
    %279 = arith.addf %278, %277 : vector<2x96xf32>
    %280 = arith.divf %278, %279 : vector<2x96xf32>
    %281 = vector.extract_strided_slice %274 {offsets = [0, 96], sizes = [2, 32], strides = [1, 1]} : vector<2x128xf32> to vector<2x32xf32>
    %282 = math.tanh %281 : vector<2x32xf32>
    %283 = vector.extract_strided_slice %280 {offsets = [0, 0], sizes = [2, 32], strides = [1, 1]} : vector<2x96xf32> to vector<2x32xf32>
    %284 = vector.extract_strided_slice %280 {offsets = [0, 32], sizes = [2, 32], strides = [1, 1]} : vector<2x96xf32> to vector<2x32xf32>
    %285 = vector.extract_strided_slice %280 {offsets = [0, 64], sizes = [2, 32], strides = [1, 1]} : vector<2x96xf32> to vector<2x32xf32>
    %286 = arith.mulf %284, %268 : vector<2x32xf32>
    %287 = arith.mulf %283, %282 : vector<2x32xf32>
    %288 = arith.addf %286, %287 : vector<2x32xf32>
    %289 = math.tanh %288 : vector<2x32xf32>
    %290 = arith.mulf %285, %289 : vector<2x32xf32>
    %c10_63 = arith.constant 10 : index
    %c0_64 = arith.constant 0 : index
    %291 = vector.load %arg11[%c10_63, %c0_64] : memref<16x32xf32, #tpu.memory_space<vmem>>, vector<2x32xf32>
    tpu.vector_store %arg11[%c10_63, %c0_64], %290 {strides = array<i32>} : memref<16x32xf32, #tpu.memory_space<vmem>>, vector<2x32xf32>,
    %292 = vector.extract_strided_slice %168 {offsets = [12, 0], sizes = [2, 128], strides = [1, 1]} : vector<16x128xf32> to vector<2x128xf32>
    %cst_65 = arith.constant dense<0.000000e+00> : vector<2x128xf32>
    %293 = tpu.matmul %290, %169, %cst_65 {dimension_numbers = #tpu.dot_dimension_numbers<[1], [0], [0], [1], [0, 0, 1, 1], [], []>} : vector<2x32xf32>, vector<32x128xf32>, vector<2x128xf32> -> vector<2x128xf32>
    %294 = arith.addf %292, %293 : vector<2x128xf32>
    %295 = vector.extract_strided_slice %294 {offsets = [0, 0], sizes = [2, 96], strides = [1, 1]} : vector<2x128xf32> to vector<2x96xf32>
    %296 = arith.negf %295 : vector<2x96xf32>
    %297 = math.exp %296 : vector<2x96xf32>
    %cst_66 = arith.constant 1.000000e+00 : f32
    %298 = vector.broadcast %cst_66 : f32 to vector<2x96xf32>
    %299 = arith.addf %298, %297 : vector<2x96xf32>
    %300 = arith.divf %298, %299 : vector<2x96xf32>
    %301 = vector.extract_strided_slice %294 {offsets = [0, 96], sizes = [2, 32], strides = [1, 1]} : vector<2x128xf32> to vector<2x32xf32>
    %302 = math.tanh %301 : vector<2x32xf32>
    %303 = vector.extract_strided_slice %300 {offsets = [0, 0], sizes = [2, 32], strides = [1, 1]} : vector<2x96xf32> to vector<2x32xf32>
    %304 = vector.extract_strided_slice %300 {offsets = [0, 32], sizes = [2, 32], strides = [1, 1]} : vector<2x96xf32> to vector<2x32xf32>
    %305 = vector.extract_strided_slice %300 {offsets = [0, 64], sizes = [2, 32], strides = [1, 1]} : vector<2x96xf32> to vector<2x32xf32>
    %306 = arith.mulf %304, %288 : vector<2x32xf32>
    %307 = arith.mulf %303, %302 : vector<2x32xf32>
    %308 = arith.addf %306, %307 : vector<2x32xf32>
    %309 = math.tanh %308 : vector<2x32xf32>
    %310 = arith.mulf %305, %309 : vector<2x32xf32>
    %c12_67 = arith.constant 12 : index
    %c0_68 = arith.constant 0 : index
    %311 = vector.load %arg11[%c12_67, %c0_68] : memref<16x32xf32, #tpu.memory_space<vmem>>, vector<2x32xf32>
    tpu.vector_store %arg11[%c12_67, %c0_68], %310 {strides = array<i32>} : memref<16x32xf32, #tpu.memory_space<vmem>>, vector<2x32xf32>,
    %312 = vector.extract_strided_slice %168 {offsets = [14, 0], sizes = [2, 128], strides = [1, 1]} : vector<16x128xf32> to vector<2x128xf32>
    %cst_69 = arith.constant dense<0.000000e+00> : vector<2x128xf32>
    %313 = tpu.matmul %310, %169, %cst_69 {dimension_numbers = #tpu.dot_dimension_numbers<[1], [0], [0], [1], [0, 0, 1, 1], [], []>} : vector<2x32xf32>, vector<32x128xf32>, vector<2x128xf32> -> vector<2x128xf32>
    %314 = arith.addf %312, %313 : vector<2x128xf32>
    %315 = vector.extract_strided_slice %314 {offsets = [0, 0], sizes = [2, 96], strides = [1, 1]} : vector<2x128xf32> to vector<2x96xf32>
    %316 = arith.negf %315 : vector<2x96xf32>
    %317 = math.exp %316 : vector<2x96xf32>
    %cst_70 = arith.constant 1.000000e+00 : f32
    %318 = vector.broadcast %cst_70 : f32 to vector<2x96xf32>
    %319 = arith.addf %318, %317 : vector<2x96xf32>
    %320 = arith.divf %318, %319 : vector<2x96xf32>
    %321 = vector.extract_strided_slice %314 {offsets = [0, 96], sizes = [2, 32], strides = [1, 1]} : vector<2x128xf32> to vector<2x32xf32>
    %322 = math.tanh %321 : vector<2x32xf32>
    %323 = vector.extract_strided_slice %320 {offsets = [0, 0], sizes = [2, 32], strides = [1, 1]} : vector<2x96xf32> to vector<2x32xf32>
    %324 = vector.extract_strided_slice %320 {offsets = [0, 32], sizes = [2, 32], strides = [1, 1]} : vector<2x96xf32> to vector<2x32xf32>
    %325 = vector.extract_strided_slice %320 {offsets = [0, 64], sizes = [2, 32], strides = [1, 1]} : vector<2x96xf32> to vector<2x32xf32>
    %326 = arith.mulf %324, %308 : vector<2x32xf32>
    %327 = arith.mulf %323, %322 : vector<2x32xf32>
    %328 = arith.addf %326, %327 : vector<2x32xf32>
    %329 = math.tanh %328 : vector<2x32xf32>
    %330 = arith.mulf %325, %329 : vector<2x32xf32>
    %c14_71 = arith.constant 14 : index
    %c0_72 = arith.constant 0 : index
    %331 = vector.load %arg11[%c14_71, %c0_72] : memref<16x32xf32, #tpu.memory_space<vmem>>, vector<2x32xf32>
    tpu.vector_store %arg11[%c14_71, %c0_72], %330 {strides = array<i32>} : memref<16x32xf32, #tpu.memory_space<vmem>>, vector<2x32xf32>,
    %c0_73 = arith.constant 0 : index
    %c0_74 = arith.constant 0 : index
    %332 = vector.load %arg11[%c0_73, %c0_74] : memref<16x32xf32, #tpu.memory_space<vmem>>, vector<16x32xf32>
    %c0_75 = arith.constant 0 : index
    %c0_76 = arith.constant 0 : index
    %333 = vector.load %arg6[%c0_75, %c0_76] : memref<32x128xf32, #tpu.memory_space<vmem>>, vector<32x128xf32>
    %cst_77 = arith.constant dense<0.000000e+00> : vector<16x128xf32>
    %334 = tpu.matmul %332, %333, %cst_77 {dimension_numbers = #tpu.dot_dimension_numbers<[1], [0], [0], [1], [0, 0, 1, 1], [], []>} : vector<16x32xf32>, vector<32x128xf32>, vector<16x128xf32> -> vector<16x128xf32>
    %c0_78 = arith.constant 0 : index
    %c0_79 = arith.constant 0 : index
    %335 = vector.load %arg7[%c0_78, %c0_79] : memref<32x128xf32, #tpu.memory_space<vmem>>, vector<32x128xf32>
    %cst_80 = arith.constant 0.000000e+00 : f32
    %336 = vector.broadcast %cst_80 : f32 to vector<2x32xf32>
    %cst_81 = arith.constant 0.000000e+00 : f32
    %337 = vector.broadcast %cst_81 : f32 to vector<2x32xf32>
    %338 = vector.extract_strided_slice %334 {offsets = [0, 0], sizes = [2, 128], strides = [1, 1]} : vector<16x128xf32> to vector<2x128xf32>
    %cst_82 = arith.constant dense<0.000000e+00> : vector<2x128xf32>
    %339 = tpu.matmul %336, %335, %cst_82 {dimension_numbers = #tpu.dot_dimension_numbers<[1], [0], [0], [1], [0, 0, 1, 1], [], []>} : vector<2x32xf32>, vector<32x128xf32>, vector<2x128xf32> -> vector<2x128xf32>
    %340 = arith.addf %338, %339 : vector<2x128xf32>
    %341 = vector.extract_strided_slice %340 {offsets = [0, 0], sizes = [2, 96], strides = [1, 1]} : vector<2x128xf32> to vector<2x96xf32>
    %342 = arith.negf %341 : vector<2x96xf32>
    %343 = math.exp %342 : vector<2x96xf32>
    %cst_83 = arith.constant 1.000000e+00 : f32
    %344 = vector.broadcast %cst_83 : f32 to vector<2x96xf32>
    %345 = arith.addf %344, %343 : vector<2x96xf32>
    %346 = arith.divf %344, %345 : vector<2x96xf32>
    %347 = vector.extract_strided_slice %340 {offsets = [0, 96], sizes = [2, 32], strides = [1, 1]} : vector<2x128xf32> to vector<2x32xf32>
    %348 = math.tanh %347 : vector<2x32xf32>
    %349 = vector.extract_strided_slice %346 {offsets = [0, 0], sizes = [2, 32], strides = [1, 1]} : vector<2x96xf32> to vector<2x32xf32>
    %350 = vector.extract_strided_slice %346 {offsets = [0, 32], sizes = [2, 32], strides = [1, 1]} : vector<2x96xf32> to vector<2x32xf32>
    %351 = vector.extract_strided_slice %346 {offsets = [0, 64], sizes = [2, 32], strides = [1, 1]} : vector<2x96xf32> to vector<2x32xf32>
    %352 = arith.mulf %350, %337 : vector<2x32xf32>
    %353 = arith.mulf %349, %348 : vector<2x32xf32>
    %354 = arith.addf %352, %353 : vector<2x32xf32>
    %355 = math.tanh %354 : vector<2x32xf32>
    %356 = arith.mulf %351, %355 : vector<2x32xf32>
    %c0_84 = arith.constant 0 : index
    %c0_85 = arith.constant 0 : index
    %357 = vector.load %arg8[%c0_84, %c0_85] : memref<16x32xf32, #tpu.memory_space<vmem>>, vector<2x32xf32>
    tpu.vector_store %arg8[%c0_84, %c0_85], %356 {strides = array<i32>} : memref<16x32xf32, #tpu.memory_space<vmem>>, vector<2x32xf32>,
    %358 = vector.extract_strided_slice %334 {offsets = [2, 0], sizes = [2, 128], strides = [1, 1]} : vector<16x128xf32> to vector<2x128xf32>
    %cst_86 = arith.constant dense<0.000000e+00> : vector<2x128xf32>
    %359 = tpu.matmul %356, %335, %cst_86 {dimension_numbers = #tpu.dot_dimension_numbers<[1], [0], [0], [1], [0, 0, 1, 1], [], []>} : vector<2x32xf32>, vector<32x128xf32>, vector<2x128xf32> -> vector<2x128xf32>
    %360 = arith.addf %358, %359 : vector<2x128xf32>
    %361 = vector.extract_strided_slice %360 {offsets = [0, 0], sizes = [2, 96], strides = [1, 1]} : vector<2x128xf32> to vector<2x96xf32>
    %362 = arith.negf %361 : vector<2x96xf32>
    %363 = math.exp %362 : vector<2x96xf32>
    %cst_87 = arith.constant 1.000000e+00 : f32
    %364 = vector.broadcast %cst_87 : f32 to vector<2x96xf32>
    %365 = arith.addf %364, %363 : vector<2x96xf32>
    %366 = arith.divf %364, %365 : vector<2x96xf32>
    %367 = vector.extract_strided_slice %360 {offsets = [0, 96], sizes = [2, 32], strides = [1, 1]} : vector<2x128xf32> to vector<2x32xf32>
    %368 = math.tanh %367 : vector<2x32xf32>
    %369 = vector.extract_strided_slice %366 {offsets = [0, 0], sizes = [2, 32], strides = [1, 1]} : vector<2x96xf32> to vector<2x32xf32>
    %370 = vector.extract_strided_slice %366 {offsets = [0, 32], sizes = [2, 32], strides = [1, 1]} : vector<2x96xf32> to vector<2x32xf32>
    %371 = vector.extract_strided_slice %366 {offsets = [0, 64], sizes = [2, 32], strides = [1, 1]} : vector<2x96xf32> to vector<2x32xf32>
    %372 = arith.mulf %370, %354 : vector<2x32xf32>
    %373 = arith.mulf %369, %368 : vector<2x32xf32>
    %374 = arith.addf %372, %373 : vector<2x32xf32>
    %375 = math.tanh %374 : vector<2x32xf32>
    %376 = arith.mulf %371, %375 : vector<2x32xf32>
    %c2_88 = arith.constant 2 : index
    %c0_89 = arith.constant 0 : index
    %377 = vector.load %arg8[%c2_88, %c0_89] : memref<16x32xf32, #tpu.memory_space<vmem>>, vector<2x32xf32>
    tpu.vector_store %arg8[%c2_88, %c0_89], %376 {strides = array<i32>} : memref<16x32xf32, #tpu.memory_space<vmem>>, vector<2x32xf32>,
    %378 = vector.extract_strided_slice %334 {offsets = [4, 0], sizes = [2, 128], strides = [1, 1]} : vector<16x128xf32> to vector<2x128xf32>
    %cst_90 = arith.constant dense<0.000000e+00> : vector<2x128xf32>
    %379 = tpu.matmul %376, %335, %cst_90 {dimension_numbers = #tpu.dot_dimension_numbers<[1], [0], [0], [1], [0, 0, 1, 1], [], []>} : vector<2x32xf32>, vector<32x128xf32>, vector<2x128xf32> -> vector<2x128xf32>
    %380 = arith.addf %378, %379 : vector<2x128xf32>
    %381 = vector.extract_strided_slice %380 {offsets = [0, 0], sizes = [2, 96], strides = [1, 1]} : vector<2x128xf32> to vector<2x96xf32>
    %382 = arith.negf %381 : vector<2x96xf32>
    %383 = math.exp %382 : vector<2x96xf32>
    %cst_91 = arith.constant 1.000000e+00 : f32
    %384 = vector.broadcast %cst_91 : f32 to vector<2x96xf32>
    %385 = arith.addf %384, %383 : vector<2x96xf32>
    %386 = arith.divf %384, %385 : vector<2x96xf32>
    %387 = vector.extract_strided_slice %380 {offsets = [0, 96], sizes = [2, 32], strides = [1, 1]} : vector<2x128xf32> to vector<2x32xf32>
    %388 = math.tanh %387 : vector<2x32xf32>
    %389 = vector.extract_strided_slice %386 {offsets = [0, 0], sizes = [2, 32], strides = [1, 1]} : vector<2x96xf32> to vector<2x32xf32>
    %390 = vector.extract_strided_slice %386 {offsets = [0, 32], sizes = [2, 32], strides = [1, 1]} : vector<2x96xf32> to vector<2x32xf32>
    %391 = vector.extract_strided_slice %386 {offsets = [0, 64], sizes = [2, 32], strides = [1, 1]} : vector<2x96xf32> to vector<2x32xf32>
    %392 = arith.mulf %390, %374 : vector<2x32xf32>
    %393 = arith.mulf %389, %388 : vector<2x32xf32>
    %394 = arith.addf %392, %393 : vector<2x32xf32>
    %395 = math.tanh %394 : vector<2x32xf32>
    %396 = arith.mulf %391, %395 : vector<2x32xf32>
    %c4_92 = arith.constant 4 : index
    %c0_93 = arith.constant 0 : index
    %397 = vector.load %arg8[%c4_92, %c0_93] : memref<16x32xf32, #tpu.memory_space<vmem>>, vector<2x32xf32>
    tpu.vector_store %arg8[%c4_92, %c0_93], %396 {strides = array<i32>} : memref<16x32xf32, #tpu.memory_space<vmem>>, vector<2x32xf32>,
    %398 = vector.extract_strided_slice %334 {offsets = [6, 0], sizes = [2, 128], strides = [1, 1]} : vector<16x128xf32> to vector<2x128xf32>
    %cst_94 = arith.constant dense<0.000000e+00> : vector<2x128xf32>
    %399 = tpu.matmul %396, %335, %cst_94 {dimension_numbers = #tpu.dot_dimension_numbers<[1], [0], [0], [1], [0, 0, 1, 1], [], []>} : vector<2x32xf32>, vector<32x128xf32>, vector<2x128xf32> -> vector<2x128xf32>
    %400 = arith.addf %398, %399 : vector<2x128xf32>
    %401 = vector.extract_strided_slice %400 {offsets = [0, 0], sizes = [2, 96], strides = [1, 1]} : vector<2x128xf32> to vector<2x96xf32>
    %402 = arith.negf %401 : vector<2x96xf32>
    %403 = math.exp %402 : vector<2x96xf32>
    %cst_95 = arith.constant 1.000000e+00 : f32
    %404 = vector.broadcast %cst_95 : f32 to vector<2x96xf32>
    %405 = arith.addf %404, %403 : vector<2x96xf32>
    %406 = arith.divf %404, %405 : vector<2x96xf32>
    %407 = vector.extract_strided_slice %400 {offsets = [0, 96], sizes = [2, 32], strides = [1, 1]} : vector<2x128xf32> to vector<2x32xf32>
    %408 = math.tanh %407 : vector<2x32xf32>
    %409 = vector.extract_strided_slice %406 {offsets = [0, 0], sizes = [2, 32], strides = [1, 1]} : vector<2x96xf32> to vector<2x32xf32>
    %410 = vector.extract_strided_slice %406 {offsets = [0, 32], sizes = [2, 32], strides = [1, 1]} : vector<2x96xf32> to vector<2x32xf32>
    %411 = vector.extract_strided_slice %406 {offsets = [0, 64], sizes = [2, 32], strides = [1, 1]} : vector<2x96xf32> to vector<2x32xf32>
    %412 = arith.mulf %410, %394 : vector<2x32xf32>
    %413 = arith.mulf %409, %408 : vector<2x32xf32>
    %414 = arith.addf %412, %413 : vector<2x32xf32>
    %415 = math.tanh %414 : vector<2x32xf32>
    %416 = arith.mulf %411, %415 : vector<2x32xf32>
    %c6_96 = arith.constant 6 : index
    %c0_97 = arith.constant 0 : index
    %417 = vector.load %arg8[%c6_96, %c0_97] : memref<16x32xf32, #tpu.memory_space<vmem>>, vector<2x32xf32>
    tpu.vector_store %arg8[%c6_96, %c0_97], %416 {strides = array<i32>} : memref<16x32xf32, #tpu.memory_space<vmem>>, vector<2x32xf32>,
    %418 = vector.extract_strided_slice %334 {offsets = [8, 0], sizes = [2, 128], strides = [1, 1]} : vector<16x128xf32> to vector<2x128xf32>
    %cst_98 = arith.constant dense<0.000000e+00> : vector<2x128xf32>
    %419 = tpu.matmul %416, %335, %cst_98 {dimension_numbers = #tpu.dot_dimension_numbers<[1], [0], [0], [1], [0, 0, 1, 1], [], []>} : vector<2x32xf32>, vector<32x128xf32>, vector<2x128xf32> -> vector<2x128xf32>
    %420 = arith.addf %418, %419 : vector<2x128xf32>
    %421 = vector.extract_strided_slice %420 {offsets = [0, 0], sizes = [2, 96], strides = [1, 1]} : vector<2x128xf32> to vector<2x96xf32>
    %422 = arith.negf %421 : vector<2x96xf32>
    %423 = math.exp %422 : vector<2x96xf32>
    %cst_99 = arith.constant 1.000000e+00 : f32
    %424 = vector.broadcast %cst_99 : f32 to vector<2x96xf32>
    %425 = arith.addf %424, %423 : vector<2x96xf32>
    %426 = arith.divf %424, %425 : vector<2x96xf32>
    %427 = vector.extract_strided_slice %420 {offsets = [0, 96], sizes = [2, 32], strides = [1, 1]} : vector<2x128xf32> to vector<2x32xf32>
    %428 = math.tanh %427 : vector<2x32xf32>
    %429 = vector.extract_strided_slice %426 {offsets = [0, 0], sizes = [2, 32], strides = [1, 1]} : vector<2x96xf32> to vector<2x32xf32>
    %430 = vector.extract_strided_slice %426 {offsets = [0, 32], sizes = [2, 32], strides = [1, 1]} : vector<2x96xf32> to vector<2x32xf32>
    %431 = vector.extract_strided_slice %426 {offsets = [0, 64], sizes = [2, 32], strides = [1, 1]} : vector<2x96xf32> to vector<2x32xf32>
    %432 = arith.mulf %430, %414 : vector<2x32xf32>
    %433 = arith.mulf %429, %428 : vector<2x32xf32>
    %434 = arith.addf %432, %433 : vector<2x32xf32>
    %435 = math.tanh %434 : vector<2x32xf32>
    %436 = arith.mulf %431, %435 : vector<2x32xf32>
    %c8_100 = arith.constant 8 : index
    %c0_101 = arith.constant 0 : index
    %437 = vector.load %arg8[%c8_100, %c0_101] : memref<16x32xf32, #tpu.memory_space<vmem>>, vector<2x32xf32>
    tpu.vector_store %arg8[%c8_100, %c0_101], %436 {strides = array<i32>} : memref<16x32xf32, #tpu.memory_space<vmem>>, vector<2x32xf32>,
    %438 = vector.extract_strided_slice %334 {offsets = [10, 0], sizes = [2, 128], strides = [1, 1]} : vector<16x128xf32> to vector<2x128xf32>
    %cst_102 = arith.constant dense<0.000000e+00> : vector<2x128xf32>
    %439 = tpu.matmul %436, %335, %cst_102 {dimension_numbers = #tpu.dot_dimension_numbers<[1], [0], [0], [1], [0, 0, 1, 1], [], []>} : vector<2x32xf32>, vector<32x128xf32>, vector<2x128xf32> -> vector<2x128xf32>
    %440 = arith.addf %438, %439 : vector<2x128xf32>
    %441 = vector.extract_strided_slice %440 {offsets = [0, 0], sizes = [2, 96], strides = [1, 1]} : vector<2x128xf32> to vector<2x96xf32>
    %442 = arith.negf %441 : vector<2x96xf32>
    %443 = math.exp %442 : vector<2x96xf32>
    %cst_103 = arith.constant 1.000000e+00 : f32
    %444 = vector.broadcast %cst_103 : f32 to vector<2x96xf32>
    %445 = arith.addf %444, %443 : vector<2x96xf32>
    %446 = arith.divf %444, %445 : vector<2x96xf32>
    %447 = vector.extract_strided_slice %440 {offsets = [0, 96], sizes = [2, 32], strides = [1, 1]} : vector<2x128xf32> to vector<2x32xf32>
    %448 = math.tanh %447 : vector<2x32xf32>
    %449 = vector.extract_strided_slice %446 {offsets = [0, 0], sizes = [2, 32], strides = [1, 1]} : vector<2x96xf32> to vector<2x32xf32>
    %450 = vector.extract_strided_slice %446 {offsets = [0, 32], sizes = [2, 32], strides = [1, 1]} : vector<2x96xf32> to vector<2x32xf32>
    %451 = vector.extract_strided_slice %446 {offsets = [0, 64], sizes = [2, 32], strides = [1, 1]} : vector<2x96xf32> to vector<2x32xf32>
    %452 = arith.mulf %450, %434 : vector<2x32xf32>
    %453 = arith.mulf %449, %448 : vector<2x32xf32>
    %454 = arith.addf %452, %453 : vector<2x32xf32>
    %455 = math.tanh %454 : vector<2x32xf32>
    %456 = arith.mulf %451, %455 : vector<2x32xf32>
    %c10_104 = arith.constant 10 : index
    %c0_105 = arith.constant 0 : index
    %457 = vector.load %arg8[%c10_104, %c0_105] : memref<16x32xf32, #tpu.memory_space<vmem>>, vector<2x32xf32>
    tpu.vector_store %arg8[%c10_104, %c0_105], %456 {strides = array<i32>} : memref<16x32xf32, #tpu.memory_space<vmem>>, vector<2x32xf32>,
    %458 = vector.extract_strided_slice %334 {offsets = [12, 0], sizes = [2, 128], strides = [1, 1]} : vector<16x128xf32> to vector<2x128xf32>
    %cst_106 = arith.constant dense<0.000000e+00> : vector<2x128xf32>
    %459 = tpu.matmul %456, %335, %cst_106 {dimension_numbers = #tpu.dot_dimension_numbers<[1], [0], [0], [1], [0, 0, 1, 1], [], []>} : vector<2x32xf32>, vector<32x128xf32>, vector<2x128xf32> -> vector<2x128xf32>
    %460 = arith.addf %458, %459 : vector<2x128xf32>
    %461 = vector.extract_strided_slice %460 {offsets = [0, 0], sizes = [2, 96], strides = [1, 1]} : vector<2x128xf32> to vector<2x96xf32>
    %462 = arith.negf %461 : vector<2x96xf32>
    %463 = math.exp %462 : vector<2x96xf32>
    %cst_107 = arith.constant 1.000000e+00 : f32
    %464 = vector.broadcast %cst_107 : f32 to vector<2x96xf32>
    %465 = arith.addf %464, %463 : vector<2x96xf32>
    %466 = arith.divf %464, %465 : vector<2x96xf32>
    %467 = vector.extract_strided_slice %460 {offsets = [0, 96], sizes = [2, 32], strides = [1, 1]} : vector<2x128xf32> to vector<2x32xf32>
    %468 = math.tanh %467 : vector<2x32xf32>
    %469 = vector.extract_strided_slice %466 {offsets = [0, 0], sizes = [2, 32], strides = [1, 1]} : vector<2x96xf32> to vector<2x32xf32>
    %470 = vector.extract_strided_slice %466 {offsets = [0, 32], sizes = [2, 32], strides = [1, 1]} : vector<2x96xf32> to vector<2x32xf32>
    %471 = vector.extract_strided_slice %466 {offsets = [0, 64], sizes = [2, 32], strides = [1, 1]} : vector<2x96xf32> to vector<2x32xf32>
    %472 = arith.mulf %470, %454 : vector<2x32xf32>
    %473 = arith.mulf %469, %468 : vector<2x32xf32>
    %474 = arith.addf %472, %473 : vector<2x32xf32>
    %475 = math.tanh %474 : vector<2x32xf32>
    %476 = arith.mulf %471, %475 : vector<2x32xf32>
    %c12_108 = arith.constant 12 : index
    %c0_109 = arith.constant 0 : index
    %477 = vector.load %arg8[%c12_108, %c0_109] : memref<16x32xf32, #tpu.memory_space<vmem>>, vector<2x32xf32>
    tpu.vector_store %arg8[%c12_108, %c0_109], %476 {strides = array<i32>} : memref<16x32xf32, #tpu.memory_space<vmem>>, vector<2x32xf32>,
    %478 = vector.extract_strided_slice %334 {offsets = [14, 0], sizes = [2, 128], strides = [1, 1]} : vector<16x128xf32> to vector<2x128xf32>
    %cst_110 = arith.constant dense<0.000000e+00> : vector<2x128xf32>
    %479 = tpu.matmul %476, %335, %cst_110 {dimension_numbers = #tpu.dot_dimension_numbers<[1], [0], [0], [1], [0, 0, 1, 1], [], []>} : vector<2x32xf32>, vector<32x128xf32>, vector<2x128xf32> -> vector<2x128xf32>
    %480 = arith.addf %478, %479 : vector<2x128xf32>
    %481 = vector.extract_strided_slice %480 {offsets = [0, 0], sizes = [2, 96], strides = [1, 1]} : vector<2x128xf32> to vector<2x96xf32>
    %482 = arith.negf %481 : vector<2x96xf32>
    %483 = math.exp %482 : vector<2x96xf32>
    %cst_111 = arith.constant 1.000000e+00 : f32
    %484 = vector.broadcast %cst_111 : f32 to vector<2x96xf32>
    %485 = arith.addf %484, %483 : vector<2x96xf32>
    %486 = arith.divf %484, %485 : vector<2x96xf32>
    %487 = vector.extract_strided_slice %480 {offsets = [0, 96], sizes = [2, 32], strides = [1, 1]} : vector<2x128xf32> to vector<2x32xf32>
    %488 = math.tanh %487 : vector<2x32xf32>
    %489 = vector.extract_strided_slice %486 {offsets = [0, 0], sizes = [2, 32], strides = [1, 1]} : vector<2x96xf32> to vector<2x32xf32>
    %490 = vector.extract_strided_slice %486 {offsets = [0, 32], sizes = [2, 32], strides = [1, 1]} : vector<2x96xf32> to vector<2x32xf32>
    %491 = vector.extract_strided_slice %486 {offsets = [0, 64], sizes = [2, 32], strides = [1, 1]} : vector<2x96xf32> to vector<2x32xf32>
    %492 = arith.mulf %490, %474 : vector<2x32xf32>
    %493 = arith.mulf %489, %488 : vector<2x32xf32>
    %494 = arith.addf %492, %493 : vector<2x32xf32>
    %495 = math.tanh %494 : vector<2x32xf32>
    %496 = arith.mulf %491, %495 : vector<2x32xf32>
    %c14_112 = arith.constant 14 : index
    %c0_113 = arith.constant 0 : index
    %497 = vector.load %arg8[%c14_112, %c0_113] : memref<16x32xf32, #tpu.memory_space<vmem>>, vector<2x32xf32>
    tpu.vector_store %arg8[%c14_112, %c0_113], %496 {strides = array<i32>} : memref<16x32xf32, #tpu.memory_space<vmem>>, vector<2x32xf32>,
    %c0_114 = arith.constant 0 : index
    %c0_115 = arith.constant 0 : index
    %498 = vector.load %arg9[%c0_114, %c0_115] : memref<2x32xf32, #tpu.memory_space<vmem>>, vector<2x32xf32>
    tpu.vector_store %arg9[%c0_114, %c0_115], %496 {strides = array<i32>} : memref<2x32xf32, #tpu.memory_space<vmem>>, vector<2x32xf32>,
    %c0_116 = arith.constant 0 : index
    %c0_117 = arith.constant 0 : index
    %499 = vector.load %arg10[%c0_116, %c0_117] : memref<2x32xf32, #tpu.memory_space<vmem>>, vector<2x32xf32>
    tpu.vector_store %arg10[%c0_116, %c0_117], %494 {strides = array<i32>} : memref<2x32xf32, #tpu.memory_space<vmem>>, vector<2x32xf32>,
    return
  }
  func.func @transform_0(%arg0: i32) -> (i32, i32) {
    %c0_i32 = arith.constant 0 : i32
    %c0_i32_0 = arith.constant 0 : i32
    %c0_i32_1 = arith.constant 0 : i32
    return %c0_i32, %c0_i32_0 : i32, i32
  }
  func.func @transform_1(%arg0: i32) -> (i32, i32) {
    %c0_i32 = arith.constant 0 : i32
    %c0_i32_0 = arith.constant 0 : i32
    %c0_i32_1 = arith.constant 0 : i32
    return %c0_i32, %c0_i32_0 : i32, i32
  }
  func.func @transform_2(%arg0: i32) -> (i32, i32) {
    %c0_i32 = arith.constant 0 : i32
    %c0_i32_0 = arith.constant 0 : i32
    %c0_i32_1 = arith.constant 0 : i32
    return %c0_i32, %c0_i32_0 : i32, i32
  }
  func.func @transform_3(%arg0: i32) -> (i32, i32) {
    %c0_i32 = arith.constant 0 : i32
    %c0_i32_0 = arith.constant 0 : i32
    %c0_i32_1 = arith.constant 0 : i32
    return %c0_i32, %c0_i32_0 : i32, i32
  }
  func.func @transform_4(%arg0: i32) -> (i32, i32) {
    %c0_i32 = arith.constant 0 : i32
    %c0_i32_0 = arith.constant 0 : i32
    %c0_i32_1 = arith.constant 0 : i32
    return %c0_i32, %c0_i32_0 : i32, i32
  }
  func.func @transform_5(%arg0: i32) -> (i32, i32) {
    %c0_i32 = arith.constant 0 : i32
    %c0_i32_0 = arith.constant 0 : i32
    %c0_i32_1 = arith.constant 0 : i32
    return %c0_i32, %c0_i32_0 : i32, i32
  }
  func.func @transform_6(%arg0: i32) -> (i32, i32) {
    %c0_i32 = arith.constant 0 : i32
    %c0_i32_0 = arith.constant 0 : i32
    %c0_i32_1 = arith.constant 0 : i32
    return %c0_i32, %c0_i32_0 : i32, i32
  }
  func.func @transform_7(%arg0: i32) -> (i32, i32) {
    %c0_i32 = arith.constant 0 : i32
    %c0_i32_0 = arith.constant 0 : i32
    %c0_i32_1 = arith.constant 0 : i32
    return %c0_i32, %c0_i32_0 : i32, i32
  }
  func.func @transform_8(%arg0: i32) -> (i32, i32) {
    %c0_i32 = arith.constant 0 : i32
    %c0_i32_0 = arith.constant 0 : i32
    %c0_i32_1 = arith.constant 0 : i32
    return %c0_i32, %c0_i32_0 : i32, i32
  }
  func.func @transform_9(%arg0: i32) -> (i32, i32) {
    %c0_i32 = arith.constant 0 : i32
    %c0_i32_0 = arith.constant 0 : i32
    %c0_i32_1 = arith.constant 0 : i32
    return %c0_i32, %c0_i32_0 : i32, i32
  }
}

</mosaic_0001>

<bundles_post_ra>
// kernel: recurrent_model_forward.1
= control target key start
LH: loop header
LB: loop body
LE: loop exit
PB: predicated region body
PF: predicated region fallthrough
CT: control target
= control target key end

     0   :  { %15 = vsyncpa [#allocation4], 0  ;;  %vm37_vm0 = vcmask 261120   ;;  %v3892_v4 = vmov 0.0|0.0   ;;  %vm3893_vm1 = vmmov 0   ;;  %v3894_v13 = vmov 0.0   ;;  %s4484_s0 = inlined_call_operand.vmem [shape: f32[16,32], index: 0, kind: input, shape index: {}]   ;;  %s4485_s1 = inlined_call_operand.vmem [shape: f32[32,128], index: 1, kind: input, shape index: {}]   ;;  %s4486_s2 = inlined_call_operand.vmem [shape: f32[32,128], index: 2, kind: input, shape index: {}]   ;;  %s4487_s3 = inlined_call_operand.vmem [shape: f32[32,128], index: 3, kind: input, shape index: {}]   ;;  %s4488_s4 = inlined_call_operand.vmem [shape: f32[32,128], index: 4, kind: input, shape index: {}]   ;;  %s4489_s5 = inlined_call_operand.vmem [shape: f32[32,128], index: 5, kind: input, shape index: {}]   ;;  %s4490_s6 = inlined_call_operand.vmem [shape: f32[32,128], index: 6, kind: input, shape index: {}]   ;;  %s4491_s7 = inlined_call_operand.hbm [shape: f32[16,32], index: 7, kind: output, shape index: {0}]   ;;  %s4492_s8 = inlined_call_operand.hbm [shape: f32[2,32], index: 8, kind: output, shape index: {1}]   ;;  %s4493_s9 = inlined_call_operand.hbm [shape: f32[2,32], index: 9, kind: output, shape index: {2}]  }
   0x1   :  { %v33_v0 = vld [vmem:[%s4485_s1] sm:$0xff]  ;;  %v34_v1 = vld [vmem:[%s4485_s1 + $0x8] sm:$0xff]  ;;  %3459 = vmatprep.subr.bf16.mxu1 %v3892_v4  ;;  %v35_v6 = vld [vmem:[%s4485_s1 + $0x10] sm:$0xff]  ;;  %3173 = vmatprep.mubr.msk.f32.mxu1 %vm3893_vm1, %v3894_v13 }
   0x2   :  { %v119_v2 = vld [vmem:[%s4486_s2] sm:$0xff]  ;;  %v3451_v3 = vpack.c.bf16 %v34_v1, %v33_v0  ;;  %v120_v5 = vld [vmem:[%s4486_s2 + $0x8] sm:$0xff]  ;;  %v36_v7 = vld [vmem:[%s4485_s1 + $0x18] sm:$0xff] }
   0x3   :  { %v3972_v8 = vpack.c.bf16 %v120_v5, %v119_v2  ;;  %v3455_v9 = vpack.c.bf16 %v36_v7, %v35_v6  ;;  %v121_v10 = vld [vmem:[%s4486_s2 + $0x10] sm:$0xff]  ;;  %v122_v11 = vld [vmem:[%s4486_s2 + $0x18] sm:$0xff]  ;;  %v31_v12 = vld [vmem:[%s4484_s0] sm:$0xff] }
   0x4   :  { %3452 = vmatprep.subr.bf16.mxu0 %v3451_v3  ;;  %3162 = vmatprep.mubr.msk.f32.mxu0 %vm37_vm0, %v31_v12 }
   0x5   :  { %16 = vsyncpa [#allocation6], 0  ;;  %3454 = vmatpush3.bf16.msra.mxu0 %v3451_v3  ;;  %3461 = vmatpush3.bf16.msra.mxu1 %v3972_v8  ;;  %v3987_v14 = vpack.c.bf16 %v122_v11, %v121_v10  ;;  %v32_v15 = vld [vmem:[%s4484_s0 + $0x8] sm:$0xff]  ;;  %s3895_s0 = smov 32   ;;  %s3896_s27 = smov 64   ;;  %vm225_vm2 = vcmask 254976  }
   0x6   :  { %3456 = vmatprep.subr.bf16.mxu0 %v3455_v9  ;;  %3462 = vmatprep.subr.bf16.mxu1 %v3892_v4  ;;  %vm334_vm3 = vcmask 257026   ;;  %vm558_vm4 = vcmask 261126   ;;  %vm446_vm5 = vcmask 259076   ;;  %s3899_s15 = smov [#allocation3]   ;;  %s3900_s17 = smov [#allocation7]  }
   0x7   :  { %s2927_s16 = sshll.u32 %s3899_s15, 4  ;;  %s2950_s18 = sshll.u32 %s3900_s17, 4  ;;  %s4431_s16 = int_to_ptr.vmem [resolvable:$true] %s2927_s16  ;;  %s4435_s18 = int_to_ptr.vmem [resolvable:$true] %s2950_s18 }
   0x9   :  { %3458 = vmatpush3.bf16.msra.mxu0 %v3455_v9  ;;  %3464 = vmatpush3.bf16.msra.mxu1 %v3987_v14 }
   0xa   :  { %3465 = vmatprep.subr.bf16.mxu0 %v3892_v4  ;;  %3471 = vmatprep.subr.bf16.mxu1 %v3892_v4 }
   0xc   :  { %3163 = vmatmul.mubr.msk.f32.vlgmr.msra.gmra.mrb[0].mxu0 %vm37_vm0, %v32_v15  ;;  %3174 = vmatmul.mubr.f32.vlgmr.msra.gmra.mrb[0].mxu1 %v3894_v13 }
   0xd   :  { %3467 = vmatpush3.bf16.msra.mxu0 %v3972_v8  ;;  %3184 = vmatprep.mubr.msk.f32.mxu0 %vm3893_vm1, %v3894_v13 }
   0xe   :  { %3468 = vmatprep.subr.bf16.mxu0 %v3892_v4  ;;  %3473 = vmatpush3.bf16.msra.mxu1 %v3972_v8 }
   0xf   :  { %3474 = vmatprep.subr.bf16.mxu1 %v3892_v4  ;;  %3195 = vmatprep.mubr.msk.f32.mxu1 %vm3893_vm1, %v3894_v13 }
  0x11   :  { %3470 = vmatpush3.bf16.msra.mxu0 %v3987_v14 }
  0x12   :  { %3476 = vmatpush3.bf16.msra.mxu1 %v3987_v14  ;;  %3477 = vmatprep.subr.bf16.mxu0 %v3892_v4 }
  0x13   :  { %3483 = vmatprep.subr.bf16.mxu1 %v3892_v4 }
  0xdf   :  { %v4010_v16 = vpop.f32.mrb[0].mxu0  ;;  %v192_v17 = vpop.f32.mrb[0].mxu1 }
  0xe0   :  { %v4012_v18 = vpop.f32.mrb[1].mxu0  ;;  %v3175_v19 = vpop.f32.mrb[1].mxu1 }
  0xe1   :  { %v196_v20 = vadd.f32 %v192_v17, %v4012_v18 }
  0xe3   :  { %3630 = vtanh.f32 %v196_v20  ;;  %v2967_v22 = vmul.f32 -1.442695, %v196_v20 }
  0xe5   :  { %3632 = vpow2.f32 %v2967_v22 }
  0xed   :  { %v3631_v21 = vpop.eup %3630 }
  0xee   :  { %206 = vrot.lane.b32.xlu0 %v3631_v21, %s3895_s0 }
  0xef   :  { %v3633_v23 = vpop.eup %3632 }
  0xf0   :  { %v200_v24 = vadd.f32 1.0, %v3633_v23 }
  0xf2   :  { %3634 = vrcp.f32 %v200_v24 }
  0xfc   :  { %v3635_v25 = vpop.eup %3634 }
  0xfd   :  { %v204_v28 = vmul.f32 0.0, %v3635_v25 }
 0x160   :  { %v207_v26 = vpop.permute.xlu0 %206 }
 0x161   :  { %v209_v27 = vmul.f32 %v3635_v25, %v207_v26 }
 0x163   :  { %211 = vrot.lane.b32.xlu0 %v209_v27, %s3895_s0 }
 0x1d5   :  { %v212_v29 = vpop.permute.xlu0 %211 }
 0x1d6   :  { %v214_v30 = vadd.f32 %v212_v29, %v204_v28 }
 0x1d8   :  { %3636 = vtanh.f32 %v214_v30  ;;  %v311_v46 = vrot.slane %v214_v30, 6 }
 0x1e2   :  { %v3637_v31 = vpop.eup %3636 }
 0x1e3   :  { %217 = vrot.lane.b32.xlu1 %v3637_v31, %s3895_s0 }
 0x255   :  { %v218_v32 = vpop.permute.xlu1 %217 }
 0x256   :  { %v220_v33 = vmul.f32 %v3635_v25, %v218_v32 }
 0x258   :  { %222 = vrot.lane.b32.xlu1 %v220_v33, %s3896_s27 }
 0x2ca   :  { %v223_v34 = vpop.permute.xlu1 %222 }
 0x2cb   :  { %226 = vst.msk [vmem:[#allocation2] sm:$0x3] %vm225_vm2, %v223_v34  ;;  %3185 = vmatmul.mubr.msk.f32.vlgmr.msra.gmra.mrb[2].mxu0 %vm37_vm0, %v223_v34 }
 0x2cc   :  { %3479 = vmatpush3.bf16.msra.mxu0 %v3972_v8  ;;  %3206 = vmatprep.mubr.msk.f32.mxu0 %vm3893_vm1, %v3894_v13 }
 0x2cd   :  { %3480 = vmatprep.subr.bf16.mxu0 %v3892_v4 }
 0x2d0   :  { %3482 = vmatpush3.bf16.msra.mxu0 %v3987_v14 }
 0x2d1   :  { %3489 = vmatprep.subr.bf16.mxu0 %v3892_v4 }
 0x39e   :  { %v295_v35 = vpop.f32.mrb[2].mxu0 }
 0x39f   :  { %v300_v36 = vrot.slane %v295_v35, 6  ;;  %v3186_v37 = vpop.f32.mrb[3].mxu0 }
 0x3a1   :  { %v302_v38 = vadd.f32 %v300_v36, %v4012_v18 }
 0x3a3   :  { %3638 = vtanh.f32 %v302_v38  ;;  %v2969_v40 = vmul.f32 -1.442695, %v302_v38 }
 0x3a5   :  { %3640 = vpow2.f32 %v2969_v40 }
 0x3ad   :  { %v3639_v39 = vpop.eup %3638 }
 0x3ae   :  { %315 = vrot.lane.b32.xlu0 %v3639_v39, %s3895_s0 }
 0x3af   :  { %v3641_v41 = vpop.eup %3640 }
 0x3b0   :  { %v306_v42 = vadd.f32 1.0, %v3641_v41 }
 0x3b2   :  { %3642 = vrcp.f32 %v306_v42 }
 0x3bc   :  { %v3643_v43 = vpop.eup %3642 }
 0x3bd   :  { %v313_v47 = vmul.f32 %v3643_v43, %v311_v46 }
 0x420   :  { %v316_v44 = vpop.permute.xlu0 %315 }
 0x421   :  { %v318_v45 = vmul.f32 %v3643_v43, %v316_v44 }
 0x423   :  { %320 = vrot.lane.b32.xlu1 %v318_v45, %s3895_s0 }
 0x495   :  { %v321_v48 = vpop.permute.xlu1 %320 }
 0x496   :  { %v323_v49 = vadd.f32 %v321_v48, %v313_v47 }
 0x498   :  { %3644 = vtanh.f32 %v323_v49  ;;  %v423_v2 = vrot.slane %v323_v49, 6 }
 0x4a2   :  { %v3645_v50 = vpop.eup %3644 }
 0x4a3   :  { %326 = vrot.lane.b32.xlu0 %v3645_v50, %s3895_s0 }
 0x515   :  { %v327_v51 = vpop.permute.xlu0 %326 }
 0x516   :  { %v4031_v52 = vmul.f32 %v3643_v43, %v327_v51 }
 0x518   :  { %v336_v53 = vrot.slane %v4031_v52, 2 }
 0x51a   :  { %337 = vrot.lane.b32.xlu1 %v336_v53, %s3896_s27 }
 0x58c   :  { %v338_v54 = vpop.permute.xlu1 %337 }
 0x58d   :  { %3196 = vmatmul.mubr.msk.f32.vlgmr.msra.gmra.mrb[2].mxu1 %vm37_vm0, %v338_v54 }
 0x58e   :  { %3485 = vmatpush3.bf16.msra.mxu1 %v3972_v8  ;;  %3217 = vmatprep.mubr.msk.f32.mxu1 %vm3893_vm1, %v3894_v13 }
 0x58f   :  { %3486 = vmatprep.subr.bf16.mxu1 %v3892_v4 }
 0x592   :  { %3488 = vmatpush3.bf16.msra.mxu1 %v3987_v14 }
 0x593   :  { %3495 = vmatprep.subr.bf16.mxu1 %v3892_v4 }
 0x660   :  { %v407_v55 = vpop.f32.mrb[2].mxu1 }
 0x661   :  { %v412_v56 = vrot.slane %v407_v55, 4  ;;  %v3197_v57 = vpop.f32.mrb[3].mxu1 }
 0x663   :  { %v414_v58 = vadd.f32 %v412_v56, %v4012_v18 }
 0x665   :  { %3646 = vtanh.f32 %v414_v58  ;;  %v2971_v60 = vmul.f32 -1.442695, %v414_v58 }
 0x667   :  { %3648 = vpow2.f32 %v2971_v60 }
 0x66f   :  { %v3647_v59 = vpop.eup %3646 }
 0x670   :  { %427 = vrot.lane.b32.xlu0 %v3647_v59, %s3895_s0 }
 0x671   :  { %v3649_v61 = vpop.eup %3648 }
 0x672   :  { %v418_v62 = vadd.f32 1.0, %v3649_v61 }
 0x674   :  { %3650 = vrcp.f32 %v418_v62 }
 0x67e   :  { %v3651_v63 = vpop.eup %3650 }
 0x67f   :  { %v425_v3 = vmul.f32 %v3651_v63, %v423_v2 }
 0x6e2   :  { %v428_v0 = vpop.permute.xlu0 %427 }
 0x6e3   :  { %v430_v1 = vmul.f32 %v3651_v63, %v428_v0 }
 0x6e5   :  { %432 = vrot.lane.b32.xlu1 %v430_v1, %s3895_s0 }
 0x757   :  { %v433_v5 = vpop.permute.xlu1 %432 }
 0x758   :  { %v435_v6 = vadd.f32 %v433_v5, %v425_v3 }
 0x75a   :  { %3652 = vtanh.f32 %v435_v6  ;;  %v535_v28 = vrot.slane %v435_v6, 6 }
 0x764   :  { %v3653_v7 = vpop.eup %3652 }
 0x765   :  { %438 = vrot.lane.b32.xlu0 %v3653_v7, %s3895_s0 }
 0x7d7   :  { %v439_v9 = vpop.permute.xlu0 %438 }
 0x7d8   :  { %v4046_v10 = vmul.f32 %v3651_v63, %v439_v9 }
 0x7da   :  { %v448_v11 = vrot.slane %v4046_v10, 4 }
 0x7dc   :  { %449 = vrot.lane.b32.xlu1 %v448_v11, %s3896_s27 }
 0x84e   :  { %v450_v12 = vpop.permute.xlu1 %449 }
 0x84f   :  { %3207 = vmatmul.mubr.msk.f32.vlgmr.msra.gmra.mrb[4].mxu0 %vm37_vm0, %v450_v12 }
 0x850   :  { %3491 = vmatpush3.bf16.msra.mxu0 %v3972_v8  ;;  %3228 = vmatprep.mubr.msk.f32.mxu0 %vm3893_vm1, %v3894_v13 }
 0x851   :  { %3492 = vmatprep.subr.bf16.mxu0 %v3892_v4 }
 0x854   :  { %3494 = vmatpush3.bf16.msra.mxu0 %v3987_v14 }
 0x855   :  { %3501 = vmatprep.subr.bf16.mxu0 %v3892_v4 }
 0x922   :  { %v519_v15 = vpop.f32.mrb[4].mxu0 }
 0x923   :  { %v524_v17 = vrot.slane %v519_v15, 2  ;;  %v3208_v19 = vpop.f32.mrb[5].mxu0 }
 0x925   :  { %v526_v20 = vadd.f32 %v524_v17, %v4012_v18 }
 0x927   :  { %3654 = vtanh.f32 %v526_v20  ;;  %v2973_v22 = vmul.f32 -1.442695, %v526_v20 }
 0x929   :  { %3656 = vpow2.f32 %v2973_v22 }
 0x931   :  { %v3655_v21 = vpop.eup %3654 }
 0x932   :  { %539 = vrot.lane.b32.xlu0 %v3655_v21, %s3895_s0 }
 0x933   :  { %v3657_v23 = vpop.eup %3656 }
 0x934   :  { %v530_v24 = vadd.f32 1.0, %v3657_v23 }
 0x936   :  { %3658 = vrcp.f32 %v530_v24 }
 0x940   :  { %v3659_v25 = vpop.eup %3658 }
 0x941   :  { %v537_v29 = vmul.f32 %v3659_v25, %v535_v28 }
 0x9a4   :  { %v540_v26 = vpop.permute.xlu0 %539 }
 0x9a5   :  { %v542_v27 = vmul.f32 %v3659_v25, %v540_v26 }
 0x9a7   :  { %544 = vrot.lane.b32.xlu1 %v542_v27, %s3895_s0 }
 0xa19   :  { %v545_v30 = vpop.permute.xlu1 %544 }
 0xa1a   :  { %v547_v31 = vadd.f32 %v545_v30, %v537_v29 }
 0xa1c   :  { %3660 = vtanh.f32 %v547_v31  ;;  %v644_v46 = vrot.slane %v547_v31, 6 }
 0xa26   :  { %v3661_v18 = vpop.eup %3660 }
 0xa27   :  { %550 = vrot.lane.b32.xlu0 %v3661_v18, %s3895_s0 }
 0xa99   :  { %v551_v32 = vpop.permute.xlu0 %550 }
 0xa9a   :  { %v4061_v33 = vmul.f32 %v3659_v25, %v551_v32 }
 0xa9c   :  { %v560_v34 = vrot.slane %v4061_v33, 6 }
 0xa9e   :  { %561 = vrot.lane.b32.xlu1 %v560_v34, %s3896_s27 }
 0xb10   :  { %v562_v35 = vpop.permute.xlu1 %561 }
 0xb11   :  { %3218 = vmatmul.mubr.msk.f32.vlgmr.msra.gmra.mrb[4].mxu1 %vm37_vm0, %v562_v35 }
 0xb12   :  { %3497 = vmatpush3.bf16.msra.mxu1 %v3972_v8  ;;  %3239 = vmatprep.mubr.msk.f32.mxu1 %vm3893_vm1, %v3894_v13 }
 0xb13   :  { %3498 = vmatprep.subr.bf16.mxu1 %v3892_v4 }
 0xb16   :  { %3500 = vmatpush3.bf16.msra.mxu1 %v3987_v14 }
 0xbe4   :  { %v631_v36 = vpop.f32.mrb[4].mxu1 }
 0xbe5   :  { %v635_v37 = vadd.f32 %v4010_v16, %v631_v36  ;;  %v3219_v38 = vpop.f32.mrb[5].mxu1 }
 0xbe7   :  { %3662 = vtanh.f32 %v635_v37  ;;  %v2975_v40 = vmul.f32 -1.442695, %v635_v37 }
 0xbe9   :  { %3664 = vpow2.f32 %v2975_v40 }
 0xbf1   :  { %v3663_v39 = vpop.eup %3662 }
 0xbf2   :  { %648 = vrot.lane.b32.xlu0 %v3663_v39, %s3895_s0 }
 0xbf3   :  { %v3665_v41 = vpop.eup %3664 }
 0xbf4   :  { %v639_v42 = vadd.f32 1.0, %v3665_v41 }
 0xbf6   :  { %3666 = vrcp.f32 %v639_v42 }
 0xc00   :  { %v3667_v43 = vpop.eup %3666 }
 0xc01   :  { %v646_v47 = vmul.f32 %v3667_v43, %v644_v46 }
 0xc64   :  { %v649_v44 = vpop.permute.xlu0 %648 }
 0xc65   :  { %v651_v45 = vmul.f32 %v3667_v43, %v649_v44 }
 0xc67   :  { %653 = vrot.lane.b32.xlu1 %v651_v45, %s3895_s0 }
 0xcd9   :  { %v654_v48 = vpop.permute.xlu1 %653 }
 0xcda   :  { %v656_v49 = vadd.f32 %v654_v48, %v646_v47 }
 0xcdc   :  { %3668 = vtanh.f32 %v656_v49 }
 0xce6   :  { %v3669_v50 = vpop.eup %3668 }
 0xce7   :  { %659 = vrot.lane.b32.xlu0 %v3669_v50, %s3895_s0 }
 0xd59   :  { %v660_v51 = vpop.permute.xlu0 %659 }
 0xd5a   :  { %v662_v53 = vmul.f32 %v3667_v43, %v660_v51 }
 0xd5c   :  { %664 = vrot.lane.b32.xlu1 %v662_v53, %s3896_s27 }
 0xdce   :  { %v665_v54 = vpop.permute.xlu1 %664 }
 0xdcf   :  { %667 = vst.msk [vmem:[#allocation2 + $0x8] sm:$0x3] %vm225_vm2, %v665_v54  ;;  %3229 = vmatmul.mubr.msk.f32.vlgmr.msra.gmra.mrb[6].mxu0 %vm37_vm0, %v665_v54  ;;  %v1001_v54 = vld [vmem:[%s4487_s3 + $0x8] sm:$0xff] }
 0xdd0   :  { %3503 = vmatpush3.bf16.msra.mxu0 %v3972_v8  ;;  %3250 = vmatprep.mubr.msk.f32.mxu0 %vm3893_vm1, %v3894_v13 }
 0xdd1   :  { %3504 = vmatprep.subr.bf16.mxu0 %v3892_v4 }
 0xdd4   :  { %3506 = vmatpush3.bf16.msra.mxu0 %v3987_v14  ;;  %v752_v14 = vrot.slane %v656_v49, 6 }
 0xdd5   :  { %3515 = vmatprep.subr.bf16.mxu0 %v3892_v4 }
 0xea2   :  { %v736_v55 = vpop.f32.mrb[6].mxu0 }
 0xea3   :  { %v741_v56 = vrot.slane %v736_v55, 6  ;;  %v3230_v57 = vpop.f32.mrb[7].mxu0 }
 0xea5   :  { %v743_v58 = vadd.f32 %v4010_v16, %v741_v56  ;;  %v1085_v56 = vld [vmem:[%s4488_s4] sm:$0xff] }
 0xea7   :  { %3670 = vtanh.f32 %v743_v58  ;;  %v2977_v60 = vmul.f32 -1.442695, %v743_v58  ;;  %v1002_v58 = vld [vmem:[%s4487_s3 + $0x10] sm:$0xff] }
 0xea9   :  { %3672 = vpow2.f32 %v2977_v60  ;;  %v1087_v60 = vld [vmem:[%s4488_s4 + $0x10] sm:$0xff] }
 0xeb1   :  { %v3671_v59 = vpop.eup %3670 }
 0xeb2   :  { %756 = vrot.lane.b32.xlu0 %v3671_v59, %s3895_s0  ;;  %v1003_v59 = vld [vmem:[%s4487_s3 + $0x18] sm:$0xff] }
 0xeb3   :  { %v3673_v8 = vpop.eup %3672 }
 0xeb4   :  { %v747_v61 = vadd.f32 1.0, %v3673_v8  ;;  %v3511_v8 = vpack.c.bf16 %v1003_v59, %v1002_v58 }
 0xeb6   :  { %3674 = vrcp.f32 %v747_v61  ;;  %v1088_v61 = vld [vmem:[%s4488_s4 + $0x18] sm:$0xff] }
 0xec0   :  { %v3675_v62 = vpop.eup %3674 }
 0xec1   :  { %v754_v1 = vmul.f32 %v3675_v62, %v752_v14 }
 0xf24   :  { %v757_v63 = vpop.permute.xlu0 %756 }
 0xf25   :  { %v759_v0 = vmul.f32 %v3675_v62, %v757_v63 }
 0xf27   :  { %761 = vrot.lane.b32.xlu1 %v759_v0, %s3895_s0 }
 0xf99   :  { %v762_v2 = vpop.permute.xlu1 %761 }
 0xf9a   :  { %v764_v3 = vadd.f32 %v762_v2, %v754_v1 }
 0xf9c   :  { %3676 = vtanh.f32 %v764_v3  ;;  %v863_v27 = vrot.slane %v764_v3, 6 }
 0xfa6   :  { %v3677_v5 = vpop.eup %3676 }
 0xfa7   :  { %767 = vrot.lane.b32.xlu0 %v3677_v5, %s3895_s0 }
0x1019   :  { %v768_v6 = vpop.permute.xlu0 %767 }
0x101a   :  { %v4088_v7 = vmul.f32 %v3675_v62, %v768_v6  ;;  %v4145_v62 = vpack.c.bf16 %v1088_v61, %v1087_v60 }
0x101c   :  { %v776_v9 = vrot.slane %v4088_v7, 2 }
0x101e   :  { %777 = vrot.lane.b32.xlu1 %v776_v9, %s3896_s27 }
0x1090   :  { %v778_v11 = vpop.permute.xlu1 %777 }
0x1091   :  { %3240 = vmatmul.mubr.msk.f32.vlgmr.msra.gmra.mrb[6].mxu1 %vm37_vm0, %v778_v11 }
0x1164   :  { %v847_v12 = vpop.f32.mrb[6].mxu1 }
0x1165   :  { %v852_v15 = vrot.slane %v847_v12, 4  ;;  %v3241_v17 = vpop.f32.mrb[7].mxu1 }
0x1167   :  { %v854_v19 = vadd.f32 %v4010_v16, %v852_v15 }
0x1169   :  { %3678 = vtanh.f32 %v854_v19  ;;  %v2979_v21 = vmul.f32 -1.442695, %v854_v19 }
0x116b   :  { %3680 = vpow2.f32 %v2979_v21 }
0x1173   :  { %v3679_v20 = vpop.eup %3678 }
0x1174   :  { %867 = vrot.lane.b32.xlu0 %v3679_v20, %s3895_s0 }
0x1175   :  { %v3681_v22 = vpop.eup %3680 }
0x1176   :  { %v858_v23 = vadd.f32 1.0, %v3681_v22 }
0x1178   :  { %3682 = vrcp.f32 %v858_v23 }
0x1182   :  { %v3683_v24 = vpop.eup %3682 }
0x1183   :  { %v865_v28 = vmul.f32 %v3683_v24, %v863_v27 }
0x11e6   :  { %v868_v25 = vpop.permute.xlu0 %867 }
0x11e7   :  { %v870_v26 = vmul.f32 %v3683_v24, %v868_v25 }
0x11e9   :  { %872 = vrot.lane.b32.xlu1 %v870_v26, %s3895_s0 }
0x125b   :  { %v873_v29 = vpop.permute.xlu1 %872 }
0x125c   :  { %v875_v30 = vadd.f32 %v873_v29, %v865_v28 }
0x125e   :  { %3684 = vtanh.f32 %v875_v30 }
0x1268   :  { %v3685_v31 = vpop.eup %3684 }
0x1269   :  { %878 = vrot.lane.b32.xlu0 %v3685_v31, %s3895_s0 }
0x12db   :  { %v879_v18 = vpop.permute.xlu0 %878 }
0x12dc   :  { %v881_v32 = vmul.f32 %v3683_v24, %v879_v18 }
0x12de   :  { %v887_v34 = vrot.slane %v881_v32, 4 }
0x12e0   :  { %888 = vrot.lane.b32.xlu1 %v887_v34, %s3896_s27 }
0x1352   :  { %v889_v35 = vpop.permute.xlu1 %888 }
0x1353   :  { %3251 = vmatmul.mubr.msk.f32.vlgmr.msra.gmra.mrb[8].mxu0 %vm37_vm0, %v889_v35 }
0x1354   :  { %3272 = vmatprep.mubr.msk.f32.mxu0 %vm3893_vm1, %v3894_v13 }
0x1426   :  { %v958_v36 = vpop.f32.mrb[8].mxu0 }
0x1427   :  { %v963_v37 = vrot.slane %v958_v36, 2  ;;  %v3252_v38 = vpop.f32.mrb[9].mxu0 }
0x1429   :  { %v965_v39 = vadd.f32 %v4010_v16, %v963_v37  ;;  %v974_v16 = vrot.slane %v875_v30, 6 }
0x142b   :  { %3686 = vtanh.f32 %v965_v39  ;;  %v2981_v41 = vmul.f32 -1.442695, %v965_v39 }
0x142d   :  { %3688 = vpow2.f32 %v2981_v41 }
0x1435   :  { %v3687_v40 = vpop.eup %3686 }
0x1436   :  { %978 = vrot.lane.b32.xlu0 %v3687_v40, %s3895_s0 }
0x1437   :  { %v3689_v42 = vpop.eup %3688 }
0x1438   :  { %v969_v43 = vadd.f32 1.0, %v3689_v42 }
0x143a   :  { %3690 = vrcp.f32 %v969_v43 }
0x1444   :  { %v3691_v44 = vpop.eup %3690 }
0x1445   :  { %v976_v47 = vmul.f32 %v3691_v44, %v974_v16 }
0x14a8   :  { %v979_v45 = vpop.permute.xlu0 %978 }
0x14a9   :  { %v981_v46 = vmul.f32 %v3691_v44, %v979_v45 }
0x14ab   :  { %983 = vrot.lane.b32.xlu1 %v981_v46, %s3895_s0 }
0x14af   :  { %331 = vrot.lane.b32.xlu1 %v4031_v52, %s3896_s27 }
0x14b3   :  { %555 = vrot.lane.b32.xlu1 %v4061_v33, %s3896_s27  ;;  %v1000_v33 = vld [vmem:[%s4487_s3] sm:$0xff] }
0x14b4   :  { %v3507_v55 = vpack.c.bf16 %v1001_v54, %v1000_v33 }
0x14b6   :  { %3508 = vmatprep.subr.bf16.mxu1 %v3507_v55 }
0x14b7   :  { %883 = vrot.lane.b32.xlu1 %v881_v32, %s3896_s27  ;;  %3510 = vmatpush3.bf16.msra.mxu1 %v3507_v55 }
0x14b8   :  { %3512 = vmatprep.subr.bf16.mxu1 %v3511_v8 }
0x14bb   :  { %3514 = vmatpush3.bf16.msra.mxu1 %v3511_v8 }
0x14bc   :  { %3521 = vmatprep.subr.bf16.mxu1 %v3892_v4 }
0x151d   :  { %v984_v48 = vpop.permute.xlu1 %983 }
0x151e   :  { %v986_v49 = vadd.f32 %v984_v48, %v976_v47 }
0x1520   :  { %3692 = vtanh.f32 %v986_v49 }
0x1521   :  { %v332_v50 = vpop.permute.xlu1 %331 }
0x1522   :  { %335 = vst.msk [vmem:[#allocation2] sm:$0xc] %vm334_vm3, %v332_v50 }
0x1525   :  { %v556_v51 = vpop.permute.xlu1 %555 }
0x1526   :  { %559 = vst.msk [vmem:[#allocation2] sm:$0xc0] %vm558_vm4, %v556_v51 }
0x1529   :  { %v884_v52 = vpop.permute.xlu1 %883 }
0x152a   :  { %v3693_v53 = vpop.eup %3692  ;;  %886 = vst.msk [vmem:[#allocation2 + $0x8] sm:$0x30] %vm446_vm5, %v884_v52 }
0x152b   :  { %989 = vrot.lane.b32.xlu0 %v3693_v53, %s3895_s0 }
0x152f   :  { %443 = vrot.lane.b32.xlu0 %v4046_v10, %s3896_s27  ;;  %v1086_v10 = vld [vmem:[%s4488_s4 + $0x8] sm:$0xff] }
0x1530   :  { %v4129_v57 = vpack.c.bf16 %v1086_v10, %v1085_v56 }
0x1532   :  { %3517 = vmatpush3.bf16.msra.mxu0 %v4129_v57 }
0x1533   :  { %772 = vrot.lane.b32.xlu0 %v4088_v7, %s3896_s27  ;;  %3518 = vmatprep.subr.bf16.mxu0 %v3892_v4 }
0x1536   :  { %3520 = vmatpush3.bf16.msra.mxu0 %v4145_v62 }
0x1537   :  { %3527 = vmatprep.subr.bf16.mxu0 %v3892_v4 }
0x1539   :  { %3273 = vmatmul.mubr.f32.vlgmr.msra.gmra.mrb[10].mxu0 %v3894_v13 }
0x153a   :  { %3529 = vmatpush3.bf16.msra.mxu0 %v4129_v57  ;;  %3294 = vmatprep.mubr.msk.f32.mxu0 %vm3893_vm1, %v3894_v13 }
0x153b   :  { %3530 = vmatprep.subr.bf16.mxu0 %v3892_v4 }
0x153e   :  { %3532 = vmatpush3.bf16.msra.mxu0 %v4145_v62 }
0x153f   :  { %3539 = vmatprep.subr.bf16.mxu0 %v3892_v4 }
0x159d   :  { %v990_v63 = vpop.permute.xlu0 %989 }
0x159e   :  { %v992_v0 = vmul.f32 %v3691_v44, %v990_v63 }
0x15a0   :  { %994 = vrot.lane.b32.xlu0 %v992_v0, %s3896_s27 }
0x15a1   :  { %v444_v14 = vpop.permute.xlu0 %443 }
0x15a2   :  { %447 = vst.msk [vmem:[#allocation2] sm:$0x30] %vm446_vm5, %v444_v14 }
0x15a5   :  { %v773_v1 = vpop.permute.xlu0 %772 }
0x15a6   :  { %775 = vst.msk [vmem:[#allocation2 + $0x8] sm:$0xc] %vm334_vm3, %v773_v1 }
0x15a9   :  { %v998_v2 = vld [vmem:[#allocation2] sm:$0xff] }
0x15aa   :  { %3261 = vmatprep.mubr.msk.f32.mxu1 %vm37_vm0, %v998_v2 }
0x160c   :  { %v1155_v6 = vpop.f32.mrb[10].mxu0 }
0x160d   :  { %v3274_v7 = vpop.f32.mrb[11].mxu0 }
0x1612   :  { %v995_v3 = vpop.permute.xlu0 %994 }
0x1613   :  { %997 = vst.msk [vmem:[#allocation2 + $0x8] sm:$0xc0] %vm558_vm4, %v995_v3 }
0x161a   :  { %v999_v5 = vld [vmem:[#allocation2 + $0x8] sm:$0xff] }
0x161b   :  { %3262 = vmatmul.mubr.msk.f32.vlgmr.msra.gmra.mrb[8].mxu1 %vm37_vm0, %v999_v5 }
0x161c   :  { %3523 = vmatpush3.bf16.msra.mxu1 %v4129_v57  ;;  %3283 = vmatprep.mubr.msk.f32.mxu1 %vm3893_vm1, %v3894_v13 }
0x161d   :  { %3524 = vmatprep.subr.bf16.mxu1 %v3892_v4 }
0x1620   :  { %3526 = vmatpush3.bf16.msra.mxu1 %v4145_v62 }
0x1621   :  { %3533 = vmatprep.subr.bf16.mxu1 %v3892_v4 }
0x16ee   :  { %v4169_v9 = vpop.f32.mrb[8].mxu1 }
0x16ef   :  { %v4171_v11 = vpop.f32.mrb[9].mxu1 }
0x16f0   :  { %v1159_v12 = vadd.f32 %v1155_v6, %v4171_v11 }
0x16f2   :  { %3694 = vtanh.f32 %v1159_v12  ;;  %v2984_v17 = vmul.f32 -1.442695, %v1159_v12 }
0x16f4   :  { %3696 = vpow2.f32 %v2984_v17 }
0x16fc   :  { %v3695_v15 = vpop.eup %3694 }
0x16fd   :  { %1169 = vrot.lane.b32.xlu1 %v3695_v15, %s3895_s0 }
0x16fe   :  { %v3697_v19 = vpop.eup %3696 }
0x16ff   :  { %v1163_v20 = vadd.f32 1.0, %v3697_v19 }
0x1701   :  { %3698 = vrcp.f32 %v1163_v20 }
0x170b   :  { %v3699_v21 = vpop.eup %3698 }
0x170c   :  { %v1167_v24 = vmul.f32 0.0, %v3699_v21 }
0x176f   :  { %v1170_v22 = vpop.permute.xlu1 %1169 }
0x1770   :  { %v1172_v23 = vmul.f32 %v3699_v21, %v1170_v22 }
0x1772   :  { %1174 = vrot.lane.b32.xlu0 %v1172_v23, %s3895_s0 }
0x17e4   :  { %v1175_v25 = vpop.permute.xlu0 %1174 }
0x17e5   :  { %v1177_v26 = vadd.f32 %v1175_v25, %v1167_v24 }
0x17e7   :  { %3700 = vtanh.f32 %v1177_v26  ;;  %v1273_v42 = vrot.slane %v1177_v26, 6 }
0x17f1   :  { %v3701_v27 = vpop.eup %3700 }
0x17f2   :  { %1180 = vrot.lane.b32.xlu1 %v3701_v27, %s3895_s0 }
0x1864   :  { %v1181_v28 = vpop.permute.xlu1 %1180 }
0x1865   :  { %v1183_v29 = vmul.f32 %v3699_v21, %v1181_v28 }
0x1867   :  { %1185 = vrot.lane.b32.xlu0 %v1183_v29, %s3896_s27 }
0x18d9   :  { %v1186_v30 = vpop.permute.xlu0 %1185 }
0x18da   :  { %1188 = vst.msk [vmem:[#allocation2] sm:$0x3] %vm225_vm2, %v1186_v30  ;;  %3284 = vmatmul.mubr.msk.f32.vlgmr.msra.gmra.mrb[10].mxu1 %vm37_vm0, %v1186_v30 }
0x18db   :  { %3535 = vmatpush3.bf16.msra.mxu1 %v4129_v57  ;;  %3305 = vmatprep.mubr.msk.f32.mxu1 %vm3893_vm1, %v3894_v13 }
0x18dc   :  { %3536 = vmatprep.subr.bf16.mxu1 %v3892_v4 }
0x18df   :  { %3538 = vmatpush3.bf16.msra.mxu1 %v4145_v62 }
0x18e0   :  { %3545 = vmatprep.subr.bf16.mxu1 %v3892_v4 }
0x19ad   :  { %v1257_v31 = vpop.f32.mrb[10].mxu1 }
0x19ae   :  { %v1262_v18 = vrot.slane %v1257_v31, 6  ;;  %v3285_v32 = vpop.f32.mrb[11].mxu1 }
0x19b0   :  { %v1264_v34 = vadd.f32 %v1262_v18, %v4171_v11 }
0x19b2   :  { %3702 = vtanh.f32 %v1264_v34  ;;  %v2986_v36 = vmul.f32 -1.442695, %v1264_v34 }
0x19b4   :  { %3704 = vpow2.f32 %v2986_v36 }
0x19bc   :  { %v3703_v35 = vpop.eup %3702 }
0x19bd   :  { %1277 = vrot.lane.b32.xlu1 %v3703_v35, %s3895_s0 }
0x19be   :  { %v3705_v37 = vpop.eup %3704 }
0x19bf   :  { %v1268_v38 = vadd.f32 1.0, %v3705_v37 }
0x19c1   :  { %3706 = vrcp.f32 %v1268_v38 }
0x19cb   :  { %v3707_v39 = vpop.eup %3706 }
0x19cc   :  { %v1275_v43 = vmul.f32 %v3707_v39, %v1273_v42 }
0x1a2f   :  { %v1278_v40 = vpop.permute.xlu1 %1277 }
0x1a30   :  { %v1280_v41 = vmul.f32 %v3707_v39, %v1278_v40 }
0x1a32   :  { %1282 = vrot.lane.b32.xlu0 %v1280_v41, %s3895_s0 }
0x1aa4   :  { %v1283_v44 = vpop.permute.xlu0 %1282 }
0x1aa5   :  { %v1285_v45 = vadd.f32 %v1283_v44, %v1275_v43 }
0x1aa7   :  { %3708 = vtanh.f32 %v1285_v45  ;;  %v1384_v60 = vrot.slane %v1285_v45, 6 }
0x1ab1   :  { %v3709_v46 = vpop.eup %3708 }
0x1ab2   :  { %1288 = vrot.lane.b32.xlu1 %v3709_v46, %s3895_s0 }
0x1b24   :  { %v1289_v16 = vpop.permute.xlu1 %1288 }
0x1b25   :  { %v4190_v47 = vmul.f32 %v3707_v39, %v1289_v16 }
0x1b27   :  { %v1297_v48 = vrot.slane %v4190_v47, 2 }
0x1b29   :  { %1298 = vrot.lane.b32.xlu0 %v1297_v48, %s3896_s27 }
0x1b9b   :  { %v1299_v49 = vpop.permute.xlu0 %1298 }
0x1b9c   :  { %3295 = vmatmul.mubr.msk.f32.vlgmr.msra.gmra.mrb[12].mxu0 %vm37_vm0, %v1299_v49 }
0x1b9d   :  { %3541 = vmatpush3.bf16.msra.mxu0 %v4129_v57  ;;  %3316 = vmatprep.mubr.msk.f32.mxu0 %vm3893_vm1, %v3894_v13 }
0x1b9e   :  { %3542 = vmatprep.subr.bf16.mxu0 %v3892_v4 }
0x1ba1   :  { %3544 = vmatpush3.bf16.msra.mxu0 %v4145_v62 }
0x1ba2   :  { %3551 = vmatprep.subr.bf16.mxu0 %v3892_v4 }
0x1c6f   :  { %v1368_v50 = vpop.f32.mrb[12].mxu0 }
0x1c70   :  { %v1373_v51 = vrot.slane %v1368_v50, 4  ;;  %v3296_v52 = vpop.f32.mrb[13].mxu0 }
0x1c72   :  { %v1375_v53 = vadd.f32 %v1373_v51, %v4171_v11 }
0x1c74   :  { %3710 = vtanh.f32 %v1375_v53  ;;  %v2988_v54 = vmul.f32 -1.442695, %v1375_v53 }
0x1c76   :  { %3712 = vpow2.f32 %v2988_v54 }
0x1c7e   :  { %v3711_v33 = vpop.eup %3710 }
0x1c7f   :  { %1388 = vrot.lane.b32.xlu1 %v3711_v33, %s3895_s0 }
0x1c80   :  { %v3713_v55 = vpop.eup %3712 }
0x1c81   :  { %v1379_v56 = vadd.f32 1.0, %v3713_v55 }
0x1c83   :  { %3714 = vrcp.f32 %v1379_v56 }
0x1c8d   :  { %v3715_v10 = vpop.eup %3714 }
0x1c8e   :  { %v1386_v8 = vmul.f32 %v3715_v10, %v1384_v60 }
0x1cf1   :  { %v1389_v58 = vpop.permute.xlu1 %1388 }
0x1cf2   :  { %v1391_v59 = vmul.f32 %v3715_v10, %v1389_v58 }
0x1cf4   :  { %1393 = vrot.lane.b32.xlu0 %v1391_v59, %s3895_s0 }
0x1d66   :  { %v1394_v61 = vpop.permute.xlu0 %1393 }
0x1d67   :  { %v1396_v63 = vadd.f32 %v1394_v61, %v1386_v8 }
0x1d69   :  { %3716 = vtanh.f32 %v1396_v63  ;;  %v1495_v24 = vrot.slane %v1396_v63, 6 }
0x1d73   :  { %v3717_v0 = vpop.eup %3716 }
0x1d74   :  { %1399 = vrot.lane.b32.xlu1 %v3717_v0, %s3895_s0 }
0x1de6   :  { %v1400_v14 = vpop.permute.xlu1 %1399 }
0x1de7   :  { %v4205_v1 = vmul.f32 %v3715_v10, %v1400_v14 }
0x1de9   :  { %v1408_v2 = vrot.slane %v4205_v1, 4 }
0x1deb   :  { %1409 = vrot.lane.b32.xlu0 %v1408_v2, %s3896_s27 }
0x1e5d   :  { %v1410_v3 = vpop.permute.xlu0 %1409 }
0x1e5e   :  { %3306 = vmatmul.mubr.msk.f32.vlgmr.msra.gmra.mrb[12].mxu1 %vm37_vm0, %v1410_v3 }
0x1e5f   :  { %3547 = vmatpush3.bf16.msra.mxu1 %v4129_v57  ;;  %3327 = vmatprep.mubr.msk.f32.mxu1 %vm3893_vm1, %v3894_v13 }
0x1e60   :  { %3548 = vmatprep.subr.bf16.mxu1 %v3892_v4 }
0x1e63   :  { %3550 = vmatpush3.bf16.msra.mxu1 %v4145_v62 }
0x1e64   :  { %3557 = vmatprep.subr.bf16.mxu1 %v3892_v4 }
0x1f31   :  { %v1479_v5 = vpop.f32.mrb[12].mxu1 }
0x1f32   :  { %v1484_v6 = vrot.slane %v1479_v5, 2  ;;  %v3307_v7 = vpop.f32.mrb[13].mxu1 }
0x1f34   :  { %v1486_v12 = vadd.f32 %v1484_v6, %v4171_v11 }
0x1f36   :  { %3718 = vtanh.f32 %v1486_v12  ;;  %v2990_v17 = vmul.f32 -1.442695, %v1486_v12 }
0x1f38   :  { %3720 = vpow2.f32 %v2990_v17 }
0x1f40   :  { %v3719_v15 = vpop.eup %3718 }
0x1f41   :  { %1499 = vrot.lane.b32.xlu1 %v3719_v15, %s3895_s0 }
0x1f42   :  { %v3721_v19 = vpop.eup %3720 }
0x1f43   :  { %v1490_v20 = vadd.f32 1.0, %v3721_v19 }
0x1f45   :  { %3722 = vrcp.f32 %v1490_v20 }
0x1f4f   :  { %v3723_v21 = vpop.eup %3722 }
0x1f50   :  { %v1497_v25 = vmul.f32 %v3723_v21, %v1495_v24 }
0x1fb3   :  { %v1500_v22 = vpop.permute.xlu1 %1499 }
0x1fb4   :  { %v1502_v23 = vmul.f32 %v3723_v21, %v1500_v22 }
0x1fb6   :  { %1504 = vrot.lane.b32.xlu0 %v1502_v23, %s3895_s0 }
0x2028   :  { %v1505_v26 = vpop.permute.xlu0 %1504 }
0x2029   :  { %v1507_v27 = vadd.f32 %v1505_v26, %v1497_v25 }
0x202b   :  { %3724 = vtanh.f32 %v1507_v27  ;;  %v1603_v42 = vrot.slane %v1507_v27, 6 }
0x2035   :  { %v3725_v11 = vpop.eup %3724 }
0x2036   :  { %1510 = vrot.lane.b32.xlu1 %v3725_v11, %s3895_s0 }
0x20a8   :  { %v1511_v28 = vpop.permute.xlu1 %1510 }
0x20a9   :  { %v4220_v29 = vmul.f32 %v3723_v21, %v1511_v28 }
0x20ab   :  { %v1519_v30 = vrot.slane %v4220_v29, 6 }
0x20ad   :  { %1520 = vrot.lane.b32.xlu0 %v1519_v30, %s3896_s27 }
0x211f   :  { %v1521_v31 = vpop.permute.xlu0 %1520 }
0x2120   :  { %3317 = vmatmul.mubr.msk.f32.vlgmr.msra.gmra.mrb[14].mxu0 %vm37_vm0, %v1521_v31 }
0x2121   :  { %3553 = vmatpush3.bf16.msra.mxu0 %v4129_v57  ;;  %3338 = vmatprep.mubr.msk.f32.mxu0 %vm3893_vm1, %v3894_v13 }
0x2122   :  { %3554 = vmatprep.subr.bf16.mxu0 %v3892_v4 }
0x2125   :  { %3556 = vmatpush3.bf16.msra.mxu0 %v4145_v62 }
0x21f3   :  { %v1590_v18 = vpop.f32.mrb[14].mxu0 }
0x21f4   :  { %v1594_v32 = vadd.f32 %v4169_v9, %v1590_v18  ;;  %v3318_v34 = vpop.f32.mrb[15].mxu0 }
0x21f6   :  { %3726 = vtanh.f32 %v1594_v32  ;;  %v2992_v36 = vmul.f32 -1.442695, %v1594_v32 }
0x21f8   :  { %3728 = vpow2.f32 %v2992_v36 }
0x2200   :  { %v3727_v35 = vpop.eup %3726 }
0x2201   :  { %1607 = vrot.lane.b32.xlu1 %v3727_v35, %s3895_s0 }
0x2202   :  { %v3729_v37 = vpop.eup %3728 }
0x2203   :  { %v1598_v38 = vadd.f32 1.0, %v3729_v37 }
0x2205   :  { %3730 = vrcp.f32 %v1598_v38 }
0x220f   :  { %v3731_v39 = vpop.eup %3730 }
0x2210   :  { %v1605_v43 = vmul.f32 %v3731_v39, %v1603_v42 }
0x2273   :  { %v1608_v40 = vpop.permute.xlu1 %1607 }
0x2274   :  { %v1610_v41 = vmul.f32 %v3731_v39, %v1608_v40 }
0x2276   :  { %1612 = vrot.lane.b32.xlu0 %v1610_v41, %s3895_s0 }
0x22e8   :  { %v1613_v44 = vpop.permute.xlu0 %1612 }
0x22e9   :  { %v1615_v45 = vadd.f32 %v1613_v44, %v1605_v43 }
0x22eb   :  { %3732 = vtanh.f32 %v1615_v45 }
0x22f5   :  { %v3733_v46 = vpop.eup %3732 }
0x22f6   :  { %1618 = vrot.lane.b32.xlu1 %v3733_v46, %s3895_s0 }
0x2368   :  { %v1619_v16 = vpop.permute.xlu1 %1618 }
0x2369   :  { %v1621_v48 = vmul.f32 %v3731_v39, %v1619_v16 }
0x236b   :  { %1623 = vrot.lane.b32.xlu0 %v1621_v48, %s3896_s27 }
0x23dd   :  { %v1624_v49 = vpop.permute.xlu0 %1623 }
0x23de   :  { %1626 = vst.msk [vmem:[#allocation2 + $0x8] sm:$0x3] %vm225_vm2, %v1624_v49  ;;  %3328 = vmatmul.mubr.msk.f32.vlgmr.msra.gmra.mrb[14].mxu1 %vm37_vm0, %v1624_v49 }
0x23df   :  { %3559 = vmatpush3.bf16.msra.mxu1 %v4129_v57  ;;  %3349 = vmatprep.mubr.msk.f32.mxu1 %vm3893_vm1, %v3894_v13 }
0x23e0   :  { %3560 = vmatprep.subr.bf16.mxu1 %v3892_v4 }
0x23e3   :  { %3562 = vmatpush3.bf16.msra.mxu1 %v4145_v62  ;;  %v1711_v62 = vrot.slane %v1615_v45, 6 }
0x23e4   :  { %3571 = vmatprep.subr.bf16.mxu1 %v3892_v4 }
0x24b1   :  { %v1695_v50 = vpop.f32.mrb[14].mxu1 }
0x24b2   :  { %v1700_v51 = vrot.slane %v1695_v50, 6  ;;  %v3329_v52 = vpop.f32.mrb[15].mxu1 }
0x24b4   :  { %v1702_v53 = vadd.f32 %v4169_v9, %v1700_v51  ;;  %v2044_v51 = vld [vmem:[%s4490_s6] sm:$0xff] }
0x24b6   :  { %3734 = vtanh.f32 %v1702_v53  ;;  %v2994_v54 = vmul.f32 -1.442695, %v1702_v53  ;;  %v1961_v53 = vld [vmem:[%s4489_s5 + $0x10] sm:$0xff] }
0x24b8   :  { %3736 = vpow2.f32 %v2994_v54  ;;  %v2046_v54 = vld [vmem:[%s4490_s6 + $0x10] sm:$0xff] }
0x24c0   :  { %v3735_v33 = vpop.eup %3734 }
0x24c1   :  { %1715 = vrot.lane.b32.xlu1 %v3735_v33, %s3895_s0  ;;  %v1962_v33 = vld [vmem:[%s4489_s5 + $0x18] sm:$0xff] }
0x24c2   :  { %v3737_v57 = vpop.eup %3736 }
0x24c3   :  { %v1706_v55 = vadd.f32 1.0, %v3737_v57  ;;  %v3567_v57 = vpack.c.bf16 %v1962_v33, %v1961_v53 }
0x24c5   :  { %3738 = vrcp.f32 %v1706_v55  ;;  %v2047_v55 = vld [vmem:[%s4490_s6 + $0x18] sm:$0xff] }
0x24cf   :  { %v3739_v56 = vpop.eup %3738 }
0x24d0   :  { %v1713_v59 = vmul.f32 %v3739_v56, %v1711_v62 }
0x2533   :  { %v1716_v10 = vpop.permute.xlu1 %1715 }
0x2534   :  { %v1718_v58 = vmul.f32 %v3739_v56, %v1716_v10 }
0x2536   :  { %1720 = vrot.lane.b32.xlu0 %v1718_v58, %s3895_s0 }
0x25a8   :  { %v1721_v60 = vpop.permute.xlu0 %1720 }
0x25a9   :  { %v1723_v8 = vadd.f32 %v1721_v60, %v1713_v59 }
0x25ab   :  { %3740 = vtanh.f32 %v1723_v8  ;;  %v1822_v23 = vrot.slane %v1723_v8, 6 }
0x25b5   :  { %v3741_v61 = vpop.eup %3740 }
0x25b6   :  { %1726 = vrot.lane.b32.xlu1 %v3741_v61, %s3895_s0 }
0x2628   :  { %v1727_v63 = vpop.permute.xlu1 %1726 }
0x2629   :  { %v4247_v0 = vmul.f32 %v3739_v56, %v1727_v63  ;;  %v4304_v56 = vpack.c.bf16 %v2047_v55, %v2046_v54 }
0x262b   :  { %v1735_v14 = vrot.slane %v4247_v0, 2 }
0x262d   :  { %1736 = vrot.lane.b32.xlu0 %v1735_v14, %s3896_s27 }
0x269f   :  { %v1737_v2 = vpop.permute.xlu0 %1736 }
0x26a0   :  { %3339 = vmatmul.mubr.msk.f32.vlgmr.msra.gmra.mrb[16].mxu0 %vm37_vm0, %v1737_v2 }
0x2773   :  { %v1806_v3 = vpop.f32.mrb[16].mxu0 }
0x2774   :  { %v1811_v5 = vrot.slane %v1806_v3, 4  ;;  %v3340_v6 = vpop.f32.mrb[17].mxu0 }
0x2776   :  { %v1813_v7 = vadd.f32 %v4169_v9, %v1811_v5 }
0x2778   :  { %3742 = vtanh.f32 %v1813_v7  ;;  %v2996_v15 = vmul.f32 -1.442695, %v1813_v7 }
0x277a   :  { %3744 = vpow2.f32 %v2996_v15 }
0x2782   :  { %v3743_v12 = vpop.eup %3742 }
0x2783   :  { %1826 = vrot.lane.b32.xlu1 %v3743_v12, %s3895_s0 }
0x2784   :  { %v3745_v17 = vpop.eup %3744 }
0x2785   :  { %v1817_v19 = vadd.f32 1.0, %v3745_v17 }
0x2787   :  { %3746 = vrcp.f32 %v1817_v19 }
0x2791   :  { %v3747_v20 = vpop.eup %3746 }
0x2792   :  { %v1824_v24 = vmul.f32 %v3747_v20, %v1822_v23 }
0x27f5   :  { %v1827_v21 = vpop.permute.xlu1 %1826 }
0x27f6   :  { %v1829_v22 = vmul.f32 %v3747_v20, %v1827_v21 }
0x27f8   :  { %1831 = vrot.lane.b32.xlu0 %v1829_v22, %s3895_s0 }
0x286a   :  { %v1832_v25 = vpop.permute.xlu0 %1831 }
0x286b   :  { %v1834_v26 = vadd.f32 %v1832_v25, %v1824_v24 }
0x286d   :  { %3748 = vtanh.f32 %v1834_v26 }
0x2877   :  { %v3749_v27 = vpop.eup %3748 }
0x2878   :  { %1837 = vrot.lane.b32.xlu1 %v3749_v27, %s3895_s0 }
0x28ea   :  { %v1838_v11 = vpop.permute.xlu1 %1837 }
0x28eb   :  { %v1840_v28 = vmul.f32 %v3747_v20, %v1838_v11 }
0x28ed   :  { %v1846_v30 = vrot.slane %v1840_v28, 4 }
0x28ef   :  { %1847 = vrot.lane.b32.xlu0 %v1846_v30, %s3896_s27 }
0x2961   :  { %v1848_v31 = vpop.permute.xlu0 %1847 }
0x2962   :  { %3350 = vmatmul.mubr.msk.f32.vlgmr.msra.gmra.mrb[16].mxu1 %vm37_vm0, %v1848_v31 }
0x2963   :  { %3371 = vmatprep.mubr.msk.f32.mxu1 %vm3893_vm1, %v3894_v13 }
0x2a35   :  { %v1917_v18 = vpop.f32.mrb[16].mxu1 }
0x2a36   :  { %v1922_v32 = vrot.slane %v1917_v18, 2  ;;  %v3351_v34 = vpop.f32.mrb[17].mxu1 }
0x2a38   :  { %v1924_v35 = vadd.f32 %v4169_v9, %v1922_v32  ;;  %v1933_v9 = vrot.slane %v1834_v26, 6 }
0x2a3a   :  { %3750 = vtanh.f32 %v1924_v35  ;;  %v2998_v37 = vmul.f32 -1.442695, %v1924_v35 }
0x2a3c   :  { %3752 = vpow2.f32 %v2998_v37 }
0x2a44   :  { %v3751_v36 = vpop.eup %3750 }
0x2a45   :  { %1937 = vrot.lane.b32.xlu1 %v3751_v36, %s3895_s0 }
0x2a46   :  { %v3753_v38 = vpop.eup %3752 }
0x2a47   :  { %v1928_v39 = vadd.f32 1.0, %v3753_v38 }
0x2a49   :  { %3754 = vrcp.f32 %v1928_v39 }
0x2a53   :  { %v3755_v40 = vpop.eup %3754 }
0x2a54   :  { %v1935_v43 = vmul.f32 %v3755_v40, %v1933_v9 }
0x2ab7   :  { %v1938_v41 = vpop.permute.xlu1 %1937 }
0x2ab8   :  { %v1940_v42 = vmul.f32 %v3755_v40, %v1938_v41 }
0x2aba   :  { %1942 = vrot.lane.b32.xlu0 %v1940_v42, %s3895_s0 }
0x2abe   :  { %1293 = vrot.lane.b32.xlu0 %v4190_v47, %s3896_s27  ;;  %v1959_v47 = vld [vmem:[%s4489_s5] sm:$0xff] }
0x2ac2   :  { %1515 = vrot.lane.b32.xlu0 %v4220_v29, %s3896_s27  ;;  %v1960_v29 = vld [vmem:[%s4489_s5 + $0x8] sm:$0xff]  ;;  %s3897_s5 = smov 96  }
0x2ac3   :  { %v3563_v50 = vpack.c.bf16 %v1960_v29, %v1959_v47 }
0x2ac5   :  { %3564 = vmatprep.subr.bf16.mxu0 %v3563_v50 }
0x2ac6   :  { %1842 = vrot.lane.b32.xlu0 %v1840_v28, %s3896_s27  ;;  %3566 = vmatpush3.bf16.msra.mxu0 %v3563_v50 }
0x2ac7   :  { %3568 = vmatprep.subr.bf16.mxu0 %v3567_v57 }
0x2aca   :  { %3570 = vmatpush3.bf16.msra.mxu0 %v3567_v57 }
0x2acb   :  { %3577 = vmatprep.subr.bf16.mxu0 %v3892_v4 }
0x2b2c   :  { %v1943_v44 = vpop.permute.xlu0 %1942 }
0x2b2d   :  { %v1945_v45 = vadd.f32 %v1943_v44, %v1935_v43 }
0x2b2f   :  { %3756 = vtanh.f32 %v1945_v45 }
0x2b30   :  { %v1294_v46 = vpop.permute.xlu0 %1293 }
0x2b31   :  { %1296 = vst.msk [vmem:[#allocation2] sm:$0xc] %vm334_vm3, %v1294_v46 }
0x2b34   :  { %v1516_v16 = vpop.permute.xlu0 %1515 }
0x2b35   :  { %1518 = vst.msk [vmem:[#allocation2] sm:$0xc0] %vm558_vm4, %v1516_v16 }
0x2b38   :  { %v1843_v48 = vpop.permute.xlu0 %1842 }
0x2b39   :  { %v3757_v49 = vpop.eup %3756  ;;  %1845 = vst.msk [vmem:[#allocation2 + $0x8] sm:$0x30] %vm446_vm5, %v1843_v48 }
0x2b3a   :  { %1948 = vrot.lane.b32.xlu1 %v3757_v49, %s3895_s0 }
0x2b3e   :  { %1404 = vrot.lane.b32.xlu1 %v4205_v1, %s3896_s27  ;;  %v2045_v1 = vld [vmem:[%s4490_s6 + $0x8] sm:$0xff]  ;;  %s3898_s6 = smov [#allocation5]  }
0x2b3f   :  { %v4288_v52 = vpack.c.bf16 %v2045_v1, %v2044_v51 }
0x2b41   :  { %3573 = vmatpush3.bf16.msra.mxu1 %v4288_v52 }
0x2b42   :  { %1731 = vrot.lane.b32.xlu1 %v4247_v0, %s3896_s27  ;;  %3574 = vmatprep.subr.bf16.mxu1 %v3892_v4 }
0x2b45   :  { %3576 = vmatpush3.bf16.msra.mxu1 %v4304_v56 }
0x2b46   :  { %3583 = vmatprep.subr.bf16.mxu1 %v3892_v4 }
0x2b48   :  { %3372 = vmatmul.mubr.f32.vlgmr.msra.gmra.mrb[18].mxu1 %v3894_v13 }
0x2b49   :  { %3585 = vmatpush3.bf16.msra.mxu1 %v4288_v52  ;;  %3393 = vmatprep.mubr.msk.f32.mxu1 %vm3893_vm1, %v3894_v13 }
0x2b4a   :  { %3586 = vmatprep.subr.bf16.mxu1 %v3892_v4 }
0x2b4d   :  { %3588 = vmatpush3.bf16.msra.mxu1 %v4304_v56 }
0x2b4e   :  { %3595 = vmatprep.subr.bf16.mxu1 %v3892_v4 }
0x2bac   :  { %v1949_v10 = vpop.permute.xlu1 %1948 }
0x2bad   :  { %v1951_v58 = vmul.f32 %v3755_v40, %v1949_v10 }
0x2baf   :  { %1953 = vrot.lane.b32.xlu1 %v1951_v58, %s3896_s27 }
0x2bb0   :  { %v1405_v62 = vpop.permute.xlu1 %1404 }
0x2bb1   :  { %1407 = vst.msk [vmem:[#allocation2] sm:$0x30] %vm446_vm5, %v1405_v62 }
0x2bb4   :  { %v1732_v59 = vpop.permute.xlu1 %1731 }
0x2bb5   :  { %1734 = vst.msk [vmem:[#allocation2 + $0x8] sm:$0xc] %vm334_vm3, %v1732_v59 }
0x2bb8   :  { %v1957_v60 = vld [vmem:[#allocation2] sm:$0xff] }
0x2bb9   :  { %3360 = vmatprep.mubr.msk.f32.mxu0 %vm37_vm0, %v1957_v60 }
0x2c1b   :  { %v2114_v63 = vpop.f32.mrb[18].mxu1 }
0x2c1c   :  { %v3373_v0 = vpop.f32.mrb[19].mxu1 }
0x2c21   :  { %v1954_v8 = vpop.permute.xlu1 %1953 }
0x2c22   :  { %1956 = vst.msk [vmem:[#allocation2 + $0x8] sm:$0xc0] %vm558_vm4, %v1954_v8 }
0x2c29   :  { %v1958_v61 = vld [vmem:[#allocation2 + $0x8] sm:$0xff] }
0x2c2a   :  { %3361 = vmatmul.mubr.msk.f32.vlgmr.msra.gmra.mrb[18].mxu0 %vm37_vm0, %v1958_v61 }
0x2c2b   :  { %3579 = vmatpush3.bf16.msra.mxu0 %v4288_v52  ;;  %3382 = vmatprep.mubr.msk.f32.mxu0 %vm3893_vm1, %v3894_v13 }
0x2c2c   :  { %3580 = vmatprep.subr.bf16.mxu0 %v3892_v4 }
0x2c2f   :  { %3582 = vmatpush3.bf16.msra.mxu0 %v4304_v56 }
0x2c30   :  { %3589 = vmatprep.subr.bf16.mxu0 %v3892_v4 }
0x2cfd   :  { %v4328_v14 = vpop.f32.mrb[18].mxu0 }
0x2cfe   :  { %v4330_v2 = vpop.f32.mrb[19].mxu0 }
0x2cff   :  { %v2118_v3 = vadd.f32 %v2114_v63, %v4330_v2 }
0x2d01   :  { %3758 = vtanh.f32 %v2118_v3  ;;  %v3001_v6 = vmul.f32 -1.442695, %v2118_v3 }
0x2d03   :  { %3760 = vpow2.f32 %v3001_v6 }
0x2d0b   :  { %v3759_v5 = vpop.eup %3758 }
0x2d0c   :  { %2128 = vrot.lane.b32.xlu0 %v3759_v5, %s3895_s0 }
0x2d0d   :  { %v3761_v7 = vpop.eup %3760 }
0x2d0e   :  { %v2122_v12 = vadd.f32 1.0, %v3761_v7 }
0x2d10   :  { %3762 = vrcp.f32 %v2122_v12 }
0x2d1a   :  { %v3763_v15 = vpop.eup %3762 }
0x2d1b   :  { %v2126_v20 = vmul.f32 0.0, %v3763_v15 }
0x2d7e   :  { %v2129_v17 = vpop.permute.xlu0 %2128 }
0x2d7f   :  { %v2131_v19 = vmul.f32 %v3763_v15, %v2129_v17 }
0x2d81   :  { %2133 = vrot.lane.b32.xlu1 %v2131_v19, %s3895_s0 }
0x2df3   :  { %v2134_v21 = vpop.permute.xlu1 %2133 }
0x2df4   :  { %v2136_v22 = vadd.f32 %v2134_v21, %v2126_v20 }
0x2df6   :  { %3764 = vtanh.f32 %v2136_v22  ;;  %v2232_v38 = vrot.slane %v2136_v22, 6 }
0x2e00   :  { %v3765_v23 = vpop.eup %3764 }
0x2e01   :  { %2139 = vrot.lane.b32.xlu0 %v3765_v23, %s3895_s0 }
0x2e73   :  { %v2140_v24 = vpop.permute.xlu0 %2139 }
0x2e74   :  { %v2142_v25 = vmul.f32 %v3763_v15, %v2140_v24 }
0x2e76   :  { %2144 = vrot.lane.b32.xlu1 %v2142_v25, %s3896_s27 }
0x2ee8   :  { %v2145_v26 = vpop.permute.xlu1 %2144 }
0x2ee9   :  { %2147 = vst.msk [vmem:[#allocation3] sm:$0x3] %vm225_vm2, %v2145_v26  ;;  %3383 = vmatmul.mubr.msk.f32.vlgmr.msra.gmra.mrb[20].mxu0 %vm37_vm0, %v2145_v26 }
0x2eea   :  { %3591 = vmatpush3.bf16.msra.mxu0 %v4288_v52  ;;  %3404 = vmatprep.mubr.msk.f32.mxu0 %vm3893_vm1, %v3894_v13 }
0x2eeb   :  { %3592 = vmatprep.subr.bf16.mxu0 %v3892_v4 }
0x2eee   :  { %3594 = vmatpush3.bf16.msra.mxu0 %v4304_v56 }
0x2eef   :  { %3601 = vmatprep.subr.bf16.mxu0 %v3892_v4 }
0x2fbc   :  { %v2216_v27 = vpop.f32.mrb[20].mxu0 }
0x2fbd   :  { %v2221_v11 = vrot.slane %v2216_v27, 6  ;;  %v3384_v28 = vpop.f32.mrb[21].mxu0 }
0x2fbf   :  { %v2223_v30 = vadd.f32 %v2221_v11, %v4330_v2 }
0x2fc1   :  { %3766 = vtanh.f32 %v2223_v30  ;;  %v3003_v18 = vmul.f32 -1.442695, %v2223_v30 }
0x2fc3   :  { %3768 = vpow2.f32 %v3003_v18 }
0x2fcb   :  { %v3767_v31 = vpop.eup %3766 }
0x2fcc   :  { %2236 = vrot.lane.b32.xlu0 %v3767_v31, %s3895_s0 }
0x2fcd   :  { %v3769_v32 = vpop.eup %3768 }
0x2fce   :  { %v2227_v34 = vadd.f32 1.0, %v3769_v32 }
0x2fd0   :  { %3770 = vrcp.f32 %v2227_v34 }
0x2fda   :  { %v3771_v35 = vpop.eup %3770 }
0x2fdb   :  { %v2234_v39 = vmul.f32 %v3771_v35, %v2232_v38 }
0x303e   :  { %v2237_v36 = vpop.permute.xlu0 %2236 }
0x303f   :  { %v2239_v37 = vmul.f32 %v3771_v35, %v2237_v36 }
0x3041   :  { %2241 = vrot.lane.b32.xlu1 %v2239_v37, %s3895_s0 }
0x30b3   :  { %v2242_v40 = vpop.permute.xlu1 %2241 }
0x30b4   :  { %v2244_v41 = vadd.f32 %v2242_v40, %v2234_v39 }
0x30b6   :  { %3772 = vtanh.f32 %v2244_v41  ;;  %v2343_v54 = vrot.slane %v2244_v41, 6 }
0x30c0   :  { %v3773_v42 = vpop.eup %3772 }
0x30c1   :  { %2247 = vrot.lane.b32.xlu0 %v3773_v42, %s3895_s0 }
0x3133   :  { %v2248_v9 = vpop.permute.xlu0 %2247 }
0x3134   :  { %v4349_v43 = vmul.f32 %v3771_v35, %v2248_v9 }
0x3136   :  { %v2256_v44 = vrot.slane %v4349_v43, 2 }
0x3138   :  { %2257 = vrot.lane.b32.xlu1 %v2256_v44, %s3896_s27 }
0x31aa   :  { %v2258_v45 = vpop.permute.xlu1 %2257 }
0x31ab   :  { %3394 = vmatmul.mubr.msk.f32.vlgmr.msra.gmra.mrb[20].mxu1 %vm37_vm0, %v2258_v45 }
0x31ac   :  { %3597 = vmatpush3.bf16.msra.mxu1 %v4288_v52  ;;  %3415 = vmatprep.mubr.msk.f32.mxu1 %vm3893_vm1, %v3894_v13 }
0x31ad   :  { %3598 = vmatprep.subr.bf16.mxu1 %v3892_v4 }
0x31b0   :  { %3600 = vmatpush3.bf16.msra.mxu1 %v4304_v56 }
0x31b1   :  { %3607 = vmatprep.subr.bf16.mxu1 %v3892_v4 }
0x327e   :  { %v2327_v46 = vpop.f32.mrb[20].mxu1 }
0x327f   :  { %v2332_v16 = vrot.slane %v2327_v46, 4  ;;  %v3395_v48 = vpop.f32.mrb[21].mxu1 }
0x3281   :  { %v2334_v49 = vadd.f32 %v2332_v16, %v4330_v2 }
0x3283   :  { %3774 = vtanh.f32 %v2334_v49  ;;  %v3005_v29 = vmul.f32 -1.442695, %v2334_v49 }
0x3285   :  { %3776 = vpow2.f32 %v3005_v29 }
0x328d   :  { %v3775_v47 = vpop.eup %3774 }
0x328e   :  { %2347 = vrot.lane.b32.xlu0 %v3775_v47, %s3895_s0 }
0x328f   :  { %v3777_v50 = vpop.eup %3776 }
0x3290   :  { %v2338_v51 = vadd.f32 1.0, %v3777_v50 }
0x3292   :  { %3778 = vrcp.f32 %v2338_v51 }
0x329c   :  { %v3779_v1 = vpop.eup %3778 }
0x329d   :  { %v2345_v57 = vmul.f32 %v3779_v1, %v2343_v54 }
0x3300   :  { %v2348_v53 = vpop.permute.xlu0 %2347 }
0x3301   :  { %v2350_v33 = vmul.f32 %v3779_v1, %v2348_v53 }
0x3303   :  { %2352 = vrot.lane.b32.xlu1 %v2350_v33, %s3895_s0 }
0x3375   :  { %v2353_v55 = vpop.permute.xlu1 %2352 }
0x3376   :  { %v2355_v10 = vadd.f32 %v2353_v55, %v2345_v57 }
0x3378   :  { %3780 = vtanh.f32 %v2355_v10  ;;  %v2454_v20 = vrot.slane %v2355_v10, 6 }
0x3382   :  { %v3781_v58 = vpop.eup %3780 }
0x3383   :  { %2358 = vrot.lane.b32.xlu0 %v3781_v58, %s3895_s0 }
0x33f5   :  { %v2359_v62 = vpop.permute.xlu0 %2358 }
0x33f6   :  { %v4364_v59 = vmul.f32 %v3779_v1, %v2359_v62 }
0x33f8   :  { %v2367_v60 = vrot.slane %v4364_v59, 4 }
0x33fa   :  { %2368 = vrot.lane.b32.xlu1 %v2367_v60, %s3896_s27 }
0x346c   :  { %v2369_v8 = vpop.permute.xlu1 %2368 }
0x346d   :  { %3405 = vmatmul.mubr.msk.f32.vlgmr.msra.gmra.mrb[22].mxu0 %vm37_vm0, %v2369_v8 }
0x346e   :  { %3603 = vmatpush3.bf16.msra.mxu0 %v4288_v52  ;;  %3426 = vmatprep.mubr.msk.f32.mxu0 %vm3893_vm1, %v3894_v13 }
0x346f   :  { %3604 = vmatprep.subr.bf16.mxu0 %v3892_v4 }
0x3472   :  { %3606 = vmatpush3.bf16.msra.mxu0 %v4304_v56 }
0x3473   :  { %3613 = vmatprep.subr.bf16.mxu0 %v3892_v4 }
0x3540   :  { %v2438_v61 = vpop.f32.mrb[22].mxu0 }
0x3541   :  { %v2443_v63 = vrot.slane %v2438_v61, 2  ;;  %v3406_v0 = vpop.f32.mrb[23].mxu0 }
0x3543   :  { %v2445_v3 = vadd.f32 %v2443_v63, %v4330_v2 }
0x3545   :  { %3782 = vtanh.f32 %v2445_v3  ;;  %v3007_v6 = vmul.f32 -1.442695, %v2445_v3 }
0x3547   :  { %3784 = vpow2.f32 %v3007_v6 }
0x354f   :  { %v3783_v5 = vpop.eup %3782 }
0x3550   :  { %2458 = vrot.lane.b32.xlu0 %v3783_v5, %s3895_s0 }
0x3551   :  { %v3785_v7 = vpop.eup %3784 }
0x3552   :  { %v2449_v12 = vadd.f32 1.0, %v3785_v7 }
0x3554   :  { %3786 = vrcp.f32 %v2449_v12 }
0x355e   :  { %v3787_v15 = vpop.eup %3786 }
0x355f   :  { %v2456_v21 = vmul.f32 %v3787_v15, %v2454_v20 }
0x35c2   :  { %v2459_v17 = vpop.permute.xlu0 %2458 }
0x35c3   :  { %v2461_v19 = vmul.f32 %v3787_v15, %v2459_v17 }
0x35c5   :  { %2463 = vrot.lane.b32.xlu1 %v2461_v19, %s3895_s0 }
0x3637   :  { %v2464_v22 = vpop.permute.xlu1 %2463 }
0x3638   :  { %v2466_v23 = vadd.f32 %v2464_v22, %v2456_v21 }
0x363a   :  { %3788 = vtanh.f32 %v2466_v23  ;;  %v2562_v38 = vrot.slane %v2466_v23, 6 }
0x3644   :  { %v3789_v2 = vpop.eup %3788 }
0x3645   :  { %2469 = vrot.lane.b32.xlu0 %v3789_v2, %s3895_s0 }
0x36b7   :  { %v2470_v24 = vpop.permute.xlu0 %2469 }
0x36b8   :  { %v4379_v25 = vmul.f32 %v3787_v15, %v2470_v24 }
0x36ba   :  { %v2478_v26 = vrot.slane %v4379_v25, 6 }
0x36bc   :  { %2479 = vrot.lane.b32.xlu1 %v2478_v26, %s3896_s27 }
0x372e   :  { %v2480_v27 = vpop.permute.xlu1 %2479 }
0x372f   :  { %3416 = vmatmul.mubr.msk.f32.vlgmr.msra.gmra.mrb[22].mxu1 %vm37_vm0, %v2480_v27 }
0x3730   :  { %3609 = vmatpush3.bf16.msra.mxu1 %v4288_v52  ;;  %3437 = vmatprep.mubr.msk.f32.mxu1 %vm3893_vm1, %v3894_v13 }
0x3731   :  { %3610 = vmatprep.subr.bf16.mxu1 %v3892_v4 }
0x3734   :  { %3612 = vmatpush3.bf16.msra.mxu1 %v4304_v56 }
0x3802   :  { %v2549_v11 = vpop.f32.mrb[22].mxu1 }
0x3803   :  { %v2553_v28 = vadd.f32 %v4328_v14, %v2549_v11  ;;  %v3417_v30 = vpop.f32.mrb[23].mxu1 }
0x3805   :  { %3790 = vtanh.f32 %v2553_v28  ;;  %v3009_v18 = vmul.f32 -1.442695, %v2553_v28 }
0x3807   :  { %3792 = vpow2.f32 %v3009_v18 }
0x380f   :  { %v3791_v31 = vpop.eup %3790 }
0x3810   :  { %2566 = vrot.lane.b32.xlu0 %v3791_v31, %s3895_s0 }
0x3811   :  { %v3793_v32 = vpop.eup %3792 }
0x3812   :  { %v2557_v34 = vadd.f32 1.0, %v3793_v32 }
0x3814   :  { %3794 = vrcp.f32 %v2557_v34 }
0x381e   :  { %v3795_v35 = vpop.eup %3794 }
0x381f   :  { %v2564_v39 = vmul.f32 %v3795_v35, %v2562_v38 }
0x3882   :  { %v2567_v36 = vpop.permute.xlu0 %2566 }
0x3883   :  { %v2569_v37 = vmul.f32 %v3795_v35, %v2567_v36 }
0x3885   :  { %2571 = vrot.lane.b32.xlu1 %v2569_v37, %s3895_s0 }
0x38f7   :  { %v2572_v40 = vpop.permute.xlu1 %2571 }
0x38f8   :  { %v2574_v41 = vadd.f32 %v2572_v40, %v2564_v39 }
0x38fa   :  { %3796 = vtanh.f32 %v2574_v41 }
0x3904   :  { %v3797_v42 = vpop.eup %3796 }
0x3905   :  { %2577 = vrot.lane.b32.xlu0 %v3797_v42, %s3895_s0 }
0x3977   :  { %v2578_v9 = vpop.permute.xlu0 %2577 }
0x3978   :  { %v2580_v44 = vmul.f32 %v3795_v35, %v2578_v9 }
0x397a   :  { %2582 = vrot.lane.b32.xlu1 %v2580_v44, %s3896_s27 }
0x39ec   :  { %v2583_v45 = vpop.permute.xlu1 %2582 }
0x39ed   :  { %2585 = vst.msk [vmem:[#allocation3 + $0x8] sm:$0x3] %vm225_vm2, %v2583_v45  ;;  %3427 = vmatmul.mubr.msk.f32.vlgmr.msra.gmra.mrb[24].mxu0 %vm37_vm0, %v2583_v45 }
0x39ee   :  { %3615 = vmatpush3.bf16.msra.mxu0 %v4288_v52  ;;  %3448 = vmatprep.mubr.msk.f32.mxu0 %vm3893_vm1, %v3894_v13 }
0x39ef   :  { %3616 = vmatprep.subr.bf16.mxu0 %v3892_v4  ;;  %v2670_v4 = vrot.slane %v2574_v41, 6 }
0x39f2   :  { %3618 = vmatpush3.bf16.msra.mxu0 %v4304_v56 }
0x3ac0   :  { %v2654_v46 = vpop.f32.mrb[24].mxu0 }
0x3ac1   :  { %v2659_v16 = vrot.slane %v2654_v46, 6  ;;  %v3428_v48 = vpop.f32.mrb[25].mxu0 }
0x3ac3   :  { %v2661_v49 = vadd.f32 %v4328_v14, %v2659_v16 }
0x3ac5   :  { %3798 = vtanh.f32 %v2661_v49  ;;  %v3011_v29 = vmul.f32 -1.442695, %v2661_v49 }
0x3ac7   :  { %3800 = vpow2.f32 %v3011_v29 }
0x3acf   :  { %v3799_v47 = vpop.eup %3798 }
0x3ad0   :  { %2674 = vrot.lane.b32.xlu0 %v3799_v47, %s3895_s0 }
0x3ad1   :  { %v3801_v50 = vpop.eup %3800 }
0x3ad2   :  { %v2665_v52 = vadd.f32 1.0, %v3801_v50 }
0x3ad4   :  { %3802 = vrcp.f32 %v2665_v52 }
0x3ade   :  { %v3803_v51 = vpop.eup %3802 }
0x3adf   :  { %v2672_v56 = vmul.f32 %v3803_v51, %v2670_v4 }
0x3b42   :  { %v2675_v13 = vpop.permute.xlu0 %2674 }
0x3b43   :  { %v2677_v1 = vmul.f32 %v3803_v51, %v2675_v13 }
0x3b45   :  { %2679 = vrot.lane.b32.xlu1 %v2677_v1, %s3895_s0 }
0x3bb7   :  { %v2680_v53 = vpop.permute.xlu1 %2679 }
0x3bb8   :  { %v2682_v33 = vadd.f32 %v2680_v53, %v2672_v56 }
0x3bba   :  { %3804 = vtanh.f32 %v2682_v33  ;;  %v2781_v15 = vrot.slane %v2682_v33, 6 }
0x3bc4   :  { %v3805_v54 = vpop.eup %3804 }
0x3bc5   :  { %2685 = vrot.lane.b32.xlu0 %v3805_v54, %s3895_s0 }
0x3c37   :  { %v2686_v57 = vpop.permute.xlu0 %2685 }
0x3c38   :  { %v2688_v55 = vmul.f32 %v3803_v51, %v2686_v57 }
0x3c3a   :  { %v2694_v10 = vrot.slane %v2688_v55, 2 }
0x3c3c   :  { %2695 = vrot.lane.b32.xlu1 %v2694_v10, %s3896_s27 }
0x3cae   :  { %v2696_v58 = vpop.permute.xlu1 %2695 }
0x3caf   :  { %3438 = vmatmul.mubr.msk.f32.vlgmr.msra.gmra.mrb[24].mxu1 %vm37_vm0, %v2696_v58 }
0x3d82   :  { %v2765_v62 = vpop.f32.mrb[24].mxu1 }
0x3d83   :  { %v2770_v60 = vrot.slane %v2765_v62, 4  ;;  %v3439_v8 = vpop.f32.mrb[25].mxu1 }
0x3d85   :  { %v2772_v61 = vadd.f32 %v4328_v14, %v2770_v60 }
0x3d87   :  { %3806 = vtanh.f32 %v2772_v61  ;;  %v3013_v0 = vmul.f32 -1.442695, %v2772_v61 }
0x3d89   :  { %3808 = vpow2.f32 %v3013_v0 }
0x3d91   :  { %v3807_v63 = vpop.eup %3806 }
0x3d92   :  { %2785 = vrot.lane.b32.xlu0 %v3807_v63, %s3895_s0 }
0x3d93   :  { %v3809_v3 = vpop.eup %3808 }
0x3d94   :  { %v2776_v5 = vadd.f32 1.0, %v3809_v3 }
0x3d96   :  { %3810 = vrcp.f32 %v2776_v5 }
0x3da0   :  { %v3811_v6 = vpop.eup %3810 }
0x3da1   :  { %v2783_v17 = vmul.f32 %v3811_v6, %v2781_v15 }
0x3e04   :  { %v2786_v7 = vpop.permute.xlu0 %2785 }
0x3e05   :  { %v2788_v12 = vmul.f32 %v3811_v6, %v2786_v7 }
0x3e07   :  { %2790 = vrot.lane.b32.xlu1 %v2788_v12, %s3895_s0 }
0x3e79   :  { %v2791_v19 = vpop.permute.xlu1 %2790 }
0x3e7a   :  { %v2793_v20 = vadd.f32 %v2791_v19, %v2783_v17 }
0x3e7c   :  { %3812 = vtanh.f32 %v2793_v20 }
0x3e86   :  { %v3813_v21 = vpop.eup %3812 }
0x3e87   :  { %2796 = vrot.lane.b32.xlu0 %v3813_v21, %s3895_s0 }
0x3ef9   :  { %v2797_v22 = vpop.permute.xlu0 %2796 }
0x3efa   :  { %v2799_v23 = vmul.f32 %v3811_v6, %v2797_v22 }
0x3efc   :  { %v2805_v2 = vrot.slane %v2799_v23, 4 }
0x3efe   :  { %2806 = vrot.lane.b32.xlu1 %v2805_v2, %s3896_s27 }
0x3f70   :  { %v2807_v24 = vpop.permute.xlu1 %2806 }
0x3f71   :  { %3449 = vmatmul.mubr.msk.f32.vlgmr.msra.gmra.mrb[26].mxu0 %vm37_vm0, %v2807_v24 }
0x4044   :  { %v2876_v26 = vpop.f32.mrb[26].mxu0 }
0x4045   :  { %v2881_v27 = vrot.slane %v2876_v26, 2  ;;  %v3450_v11 = vpop.f32.mrb[27].mxu0 }
0x4047   :  { %v2883_v28 = vadd.f32 %v4328_v14, %v2881_v27  ;;  %v2892_v14 = vrot.slane %v2793_v20, 6 }
0x4049   :  { %3814 = vtanh.f32 %v2883_v28  ;;  %v3015_v31 = vmul.f32 -1.442695, %v2883_v28 }
0x404b   :  { %3816 = vpow2.f32 %v3015_v31 }
0x4053   :  { %v3815_v30 = vpop.eup %3814 }
0x4054   :  { %2896 = vrot.lane.b32.xlu0 %v3815_v30, %s3895_s0 }
0x4055   :  { %v3817_v18 = vpop.eup %3816 }
0x4056   :  { %v2887_v32 = vadd.f32 1.0, %v3817_v18 }
0x4058   :  { %3818 = vrcp.f32 %v2887_v32 }
0x4062   :  { %v3819_v34 = vpop.eup %3818 }
0x4063   :  { %v2894_v37 = vmul.f32 %v3819_v34, %v2892_v14 }
0x40c6   :  { %v2897_v35 = vpop.permute.xlu0 %2896 }
0x40c7   :  { %v2899_v36 = vmul.f32 %v3819_v34, %v2897_v35 }
0x40c9   :  { %2901 = vrot.lane.b32.xlu1 %v2899_v36, %s3895_s0 }
0x40cd   :  { %2363 = vrot.lane.b32.xlu1 %v4364_v59, %s3896_s27 }
0x40d1   :  { %2690 = vrot.lane.b32.xlu1 %v2688_v55, %s3896_s27 }
0x413b   :  { %v2902_v38 = vpop.permute.xlu1 %2901 }
0x413c   :  { %v2904_v39 = vadd.f32 %v2902_v38, %v2894_v37 }
0x413e   :  { %3820 = vtanh.f32 %v2904_v39 }
0x413f   :  { %v2364_v40 = vpop.permute.xlu1 %2363 }
0x4140   :  { %2366 = vst.msk [vmem:[#allocation3] sm:$0x30] %vm446_vm5, %v2364_v40 }
0x4143   :  { %v2691_v41 = vpop.permute.xlu1 %2690 }
0x4144   :  { %2693 = vst.msk [vmem:[#allocation3 + $0x8] sm:$0xc] %vm334_vm3, %v2691_v41 }
0x4148   :  { %v3821_v42 = vpop.eup %3820 }
0x4149   :  { %2907 = vrot.lane.b32.xlu0 %v3821_v42, %s3895_s0  ;;  %s2940_s0 = sshll.u32 %s3898_s6, 4  ;;  %s2941_s0 = int_to_ptr.vmem [resolvable:$true] %s2940_s0 }
0x414a   :  { %p3827_p1 = scmp.lt.s32.totalorder %s2941_s0, %s2941_s0 }
0x414d   :  { %2252 = vrot.lane.b32.xlu0 %v4349_v43, %s3896_s27 }
0x4151   :  { %2474 = vrot.lane.b32.xlu0 %v4379_v25, %s3896_s27 }
0x4155   :  { %2801 = vrot.lane.b32.xlu0 %v2799_v23, %s3896_s27 }
0x41bb   :  { %v2908_v59 = vpop.permute.xlu0 %2907 }
0x41bc   :  { %v2910_v9 = vmul.f32 %v3819_v34, %v2908_v59 }
0x41be   :  { %2912 = vrot.lane.b32.xlu1 %v2910_v9, %s3896_s27  ;;  %s3822_s27 = scalar_lea.vmem %s2941_s0, 32 }
0x41bf   :  { %v2253_v44 = vpop.permute.xlu0 %2252  ;;  %p3823_p0 = scmp.ne.s32.totalorder %s2941_s0, %s3822_s27  ;;  %p3828_p2 = scmp.lt.s32.totalorder %s3822_s27, %s3822_s27 }
0x41c0   :  { %2255 = vst.msk [vmem:[#allocation3] sm:$0xc] %vm334_vm3, %v2253_v44 }
0x41c1   :  { %p3829_p3 = por %p3828_p2, %p3827_p1 }
0x41c2   :  { %2918 = vrot.lane.b32.xlu1 %v2904_v39, %s3897_s5 }
0x41c3   :  { %v2475_v45 = vpop.permute.xlu0 %2474  ;;  %p3830_p4 = pnand %p3829_p3, %p3823_p0 }
0x41c4   :  { %2477 = vst.msk [vmem:[#allocation3] sm:$0xc0] %vm558_vm4, %v2475_v45 }
0x41c7   :  { %v2802_v46 = vpop.permute.xlu0 %2801 }
0x41c8   :  { %2804 = vst.msk [vmem:[#allocation3 + $0x8] sm:$0x30] %vm446_vm5, %v2802_v46 }
0x4230   :  { %v2913_v43 = vpop.permute.xlu1 %2912 }
0x4231   :  { %2915 = vst.msk [vmem:[#allocation3 + $0x8] sm:$0xc0] %vm558_vm4, %v2913_v43  ;;  %2916 = vst.msk [vmem:[#allocation5 - $0x6] sm:$0xc0] %vm558_vm4, %v2913_v43 }
0x4232   :  { %3833 = shalt.err (!%p3830_p4)
}
0x4233   :  { %s3834_s21 = scalar_lea.hbm %s4492_s8, 32 }
0x4234   :  { %p3835_p5 = scmp.ne.s32.totalorder %s4492_s8, %s3834_s21  ;;  %p3838_p6 = scmp.lt.u32.totalorder %s3834_s21, %s4492_s8 }
0x4236   :  { %p3840_p7 = pnand %p3838_p6, %p3835_p5 }
0x4238   :  { %3843 = shalt.err (!%p3840_p7)
}
0x4239   :  { %2943 = dma.vmem_to_hbm [thread:$0]  %s2941_s0, 32, %s4492_s8, [#allocation6]  }
0x423a   :  { %s3844_s26 = scalar_lea.vmem %s4431_s16, 256  ;;  %p3849_p9 = scmp.lt.s32.totalorder %s4431_s16, %s4431_s16 }
0x423b   :  { %p3845_p8 = scmp.ne.s32.totalorder %s4431_s16, %s3844_s26  ;;  %p3850_p10 = scmp.lt.s32.totalorder %s3844_s26, %s3844_s26 }
0x423d   :  { %p3851_p11 = por %p3850_p10, %p3849_p9 }
0x423f   :  { %p3852_p12 = pnand %p3851_p11, %p3845_p8 }
0x4241   :  { %3855 = shalt.err (!%p3852_p12)
}
0x4242   :  { %s3856_s28 = scalar_lea.hbm %s4491_s7, 256 }
0x4243   :  { %p3857_p13 = scmp.ne.s32.totalorder %s4491_s7, %s3856_s28  ;;  %p3860_p0 = scmp.lt.u32.totalorder %s3856_s28, %s4491_s7 }
0x4245   :  { %p3862_p1 = pnand %p3860_p0, %p3857_p13 }
0x4247   :  { %3865 = shalt.err (!%p3862_p1)
}
0x4248   :  { %s3901_s8 = smov 128   ;;  %s3902_s12 = smov 8   ;;  %v2919_v25 = vpop.permute.xlu1 %2918 }
0x4249   :  { %2933 = dma.vmem_to_hbm [thread:$0]  %s4431_s16, 256, %s4491_s7, [#allocation4], %s3901_s8, %s3901_s8, %s3902_s12   ;;  %2921 = vst.msk [vmem:[#allocation7 - $0x6] sm:$0xc0] %vm558_vm4, %v2919_v25 }
0x424a   :  { %s3866_s5 = scalar_lea.vmem %s4435_s18, 32  ;;  %p3871_p3 = scmp.lt.s32.totalorder %s4435_s18, %s4435_s18 }
0x424b   :  { %p3867_p2 = scmp.ne.s32.totalorder %s4435_s18, %s3866_s5  ;;  %p3872_p4 = scmp.lt.s32.totalorder %s3866_s5, %s3866_s5 }
0x424d   :  { %p3873_p5 = por %p3872_p4, %p3871_p3 }
0x424f   :  { %p3874_p6 = pnand %p3873_p5, %p3867_p2 }
0x4251   :  { %3877 = shalt.err (!%p3874_p6)
}
0x4252   :  { %s3878_s15 = scalar_lea.hbm %s4493_s9, 32 }
0x4253   :  { %p3879_p7 = scmp.ne.s32.totalorder %s4493_s9, %s3878_s15  ;;  %p3882_p8 = scmp.lt.u32.totalorder %s3878_s15, %s4493_s9 }
0x4255   :  { %p3884_p9 = pnand %p3882_p8, %p3879_p7 }
0x4257   :  { %3887 = shalt.err (!%p3884_p9)
}
0x4258   :  { %2953 = dma.vmem_to_hbm [thread:$0]  %s4435_s18, 32, %s4493_s9, [#allocation6]  }
0x4259   :  { %3888 = dma.done.wait [#allocation4], 256  }
0x425a   :  { %3889 = vsyncadd [#allocation4], 4294967040 }
0x425b   :  { %3890 = dma.done.wait [#allocation6], 64  }
0x425c   :  { %3891 = vsyncadd [#allocation6], 4294967232 }
0x425d   :  { %2963 = vsyncpa [#allocation4], 1 }
0x425e   :  { %2964 = vsyncpa [#allocation6], 1 }

</bundles_post_ra>
